<compile_context>
chip_gen: v5e
topology: v5e:2x2
jax: 0.10.0
libtpu: 0.0.40
codegen_flags: <defaults>
</compile_context>

<pallas_src>
import functools
import math

import jax
import jax.numpy as jnp
from jax.experimental import pallas as pl
from jax.experimental.pallas import tpu as pltpu


# ----------------------------------------------------------------------------
# Helpers
# ----------------------------------------------------------------------------
def _layernorm(h, gamma, beta, eps=1e-5):
    mu = jnp.mean(h, axis=-1, keepdims=True)
    var = jnp.mean(jnp.square(h - mu), axis=-1, keepdims=True)
    return (h - mu) * jax.lax.rsqrt(var + eps) * gamma + beta


def _largest_divisor_leq(n, cap):
    cap = max(1, min(n, cap))
    for d in range(cap, 0, -1):
        if n % d == 0:
            return d
    return 1


def _default_vmem_limit():
    # ~75% of physical VMEM, capped (v5e/v6e: 128 MiB -> ~96 MiB,
    # v7x: 64 MiB/TC -> 48 MiB).  Fallback if the query is unavailable.
    try:
        info = pltpu.get_tpu_info()
        cap = getattr(info, "vmem_capacity_bytes", None)
        if cap:
            return int(min(cap * 3 // 4, 100 * 1024 * 1024))
    except Exception:
        pass
    return 64 * 1024 * 1024


# ----------------------------------------------------------------------------
# Kernel
# ----------------------------------------------------------------------------
def _stacked_encoder_kernel(*refs, num_heads, num_layers, use_mask,
                            use_final_norm, kv_block, ff_block):
    """Grid = (B//TB, L).  One grid step applies one encoder layer to a block
    of TB sequences whose (TB, S, D) activation stays resident in VMEM scratch
    across the layer axis."""
    idx = 0
    x_ref = refs[idx]; idx += 1
    mask_ref = None
    if use_mask:
        mask_ref = refs[idx]; idx += 1
    (wqkv_ref, bqkv_ref, wo_ref, w1_ref, b1_ref, w2_ref,
     vec_ref) = refs[idx:idx + 7]
    idx += 7
    fin_g_ref = fin_b_ref = None
    if use_final_norm:
        fin_g_ref, fin_b_ref = refs[idx:idx + 2]; idx += 2
    out_ref = refs[idx]; idx += 1
    act_ref = refs[idx]                                   # VMEM scratch (TB,S,D)

    l = pl.program_id(1)
    TB, S, D = act_ref.shape
    H = num_heads
    Dh = D // H
    M = TB * S

    # Layer 0: load this batch block's activation from the input block.
    @pl.when(l == 0)
    def _():
        act_ref[...] = x_ref[...].astype(jnp.float32)

    x = act_ref[...].reshape(M, D)                        # (M, D) f32
    xb = x.astype(jnp.bfloat16)

    # packed per-layer vectors: [bo, b2, ln1_g, ln1_b, ln2_g, ln2_b]
    vecs = vec_ref[0]                                     # (6, D) f32
    bo, b2 = vecs[0:1], vecs[1:2]
    ln1_g, ln1_b = vecs[2:3], vecs[3:4]
    ln2_g, ln2_b = vecs[4:5], vecs[5:6]

    # ---- fused QKV projection (softmax scale pre-folded into Q columns) ----
    qkv = jnp.dot(xb, wqkv_ref[0],
                  preferred_element_type=jnp.float32) + bqkv_ref[0]   # (M, 3D)
    qkv_bf = qkv.astype(jnp.bfloat16)                     # single bf16 cast

    # TODO(synk): for Dh < 128 this head split triggers XLU relayouts; a
    # head-grouped layout (groups of combined width 128) would avoid them.
    def split_heads(t2d):                                 # (M, D) -> (TB*H, S, Dh)
        return (t2d.reshape(TB, S, H, Dh)
                .transpose(0, 2, 1, 3)
                .reshape(TB * H, S, Dh))

    q = split_heads(qkv_bf[:, :D])
    k = split_heads(qkv_bf[:, D:2 * D])
    v = split_heads(qkv_bf[:, 2 * D:])

    mask_full = None
    if use_mask:
        mask_full = mask_ref[...].astype(jnp.float32)     # (S, S)

    # ---- flash-style online softmax over KV blocks (bounded working set) ----
    n_kv = S // kv_block
    m_i = jnp.full((TB * H, S, 1), -1e30, jnp.float32)
    l_i = jnp.zeros((TB * H, S, 1), jnp.float32)
    acc = jnp.zeros((TB * H, S, Dh), jnp.float32)
    for kb in range(n_kv):
        c0, c1 = kb * kv_block, (kb + 1) * kv_block
        k_blk = k[:, c0:c1]                               # (TB*H, kv, Dh)
        v_blk = v[:, c0:c1]
        s = jnp.einsum('nqd,nkd->nqk', q, k_blk,
                       preferred_element_type=jnp.float32)   # (TB*H, S, kv)
        if use_mask:
            s = s + mask_full[:, c0:c1][None]
        m_new = jnp.maximum(m_i, jnp.max(s, axis=-1, keepdims=True))
        alpha = jnp.exp(m_i - m_new)
        p = jnp.exp(s - m_new)
        l_i = alpha * l_i + jnp.sum(p, axis=-1, keepdims=True)
        acc = alpha * acc + jnp.einsum('nqk,nkd->nqd', p.astype(jnp.bfloat16),
                                       v_blk,
                                       preferred_element_type=jnp.float32)
        m_i = m_new

    # divide on the EUP (approx recip is fine: additive masks keep denom >= 1)
    ctx = acc * pl.reciprocal(l_i, approx=True)           # (TB*H, S, Dh)
    ctx = (ctx.reshape(TB, H, S, Dh)
           .transpose(0, 2, 1, 3)
           .reshape(M, D))

    # ---- single head-concatenated output projection ----
    attn = jnp.dot(ctx.astype(jnp.bfloat16), wo_ref[0],
                   preferred_element_type=jnp.float32) + bo

    # ---- residual + LayerNorm 1 (post-norm) ----
    h1 = _layernorm(x + attn, ln1_g, ln1_b)

    # ---- feed-forward: Linear -> ReLU -> Linear, tiled over F ----
    F = w1_ref.shape[2]
    n_ff = F // ff_block
    h1b = h1.astype(jnp.bfloat16)
    b1_row = b1_ref[0]                                    # (1, F)
    ff = jnp.zeros((M, D), jnp.float32)
    for c in range(n_ff):
        c0, c1 = c * ff_block, (c + 1) * ff_block
        f_c = jnp.dot(h1b, w1_ref[0, :, c0:c1],
                      preferred_element_type=jnp.float32)
        f_c = jnp.maximum(f_c + b1_row[:, c0:c1], 0.0)
        ff = ff + jnp.dot(f_c.astype(jnp.bfloat16), w2_ref[0, c0:c1, :],
                          preferred_element_type=jnp.float32)
    ff = ff + b2

    # ---- residual + LayerNorm 2 ----
    h2 = _layernorm(h1 + ff, ln2_g, ln2_b)
    act_ref[...] = h2.reshape(TB, S, D)

    # ---- last layer: optional final LayerNorm, write output block ----
    @pl.when(l == num_layers - 1)
    def _():
        y = h2
        if use_final_norm:
            y = _layernorm(y, fin_g_ref[...], fin_b_ref[...])
        out_ref[...] = y.reshape(TB, S, D).astype(out_ref.dtype)


# ----------------------------------------------------------------------------
# Wrapper
# ----------------------------------------------------------------------------
def replica_transformer_encoder(src, params, mask=None, *, num_heads,
                                batch_block=None, kv_block=None,
                                ff_block=None, vmem_limit_bytes=None):
    """Pallas equivalent of ReplicaTransformerEncoder.forward (eval mode).

    src:  (B, S, D) float32
    mask: optional (S, S) additive float mask
    params: {'stacked': dict of layer-stacked weights, 'norm': (g, b) or None}

    For best TPU performance D, 3*D and F should be multiples of 128 and
    TB*S a multiple of 8 (the small demo shapes below do not satisfy this).
    """
    B, S, D = src.shape
    st = params['stacked']
    L = st['wqkv'].shape[0]
    Fdim = st['w1'].shape[2]
    H = num_heads
    Dh = D // H
    use_mask = mask is not None
    norm = params.get('norm')
    use_final_norm = norm is not None

    # ---- tiling choices ----
    # TODO(synk): on v7x prefer B // TB >= 2 (and even) so the "parallel"
    # batch axis shards across both TensorCores; VMEM budget is per TC.
    TB = batch_block if batch_block else _largest_divisor_leq(B, 8)
    if B % TB:
        TB = _largest_divisor_leq(B, TB)
    KV = kv_block if kv_block else _largest_divisor_leq(S, 512)
    if S % KV:
        KV = S
    FC = ff_block if ff_block else _largest_divisor_leq(Fdim, 2048)
    if Fdim % FC:
        FC = Fdim

    # ---- fold the softmax 1/sqrt(Dh) scale into the Q part of QKV ----
    scale = 1.0 / math.sqrt(Dh)
    wqkv = st['wqkv'].astype(jnp.float32)
    wqkv = wqkv.at[:, :, :D].multiply(scale).astype(jnp.bfloat16)
    bqkv = st['bqkv'].astype(jnp.float32)
    bqkv = bqkv.at[:, :, :D].multiply(scale)

    # ---- pack the six (L, 1, D) per-layer vectors into one stream ----
    vecs = jnp.concatenate(
        [st['bo'], st['b2'], st['ln1_g'], st['ln1_b'], st['ln2_g'],
         st['ln2_b']], axis=1).astype(jnp.float32)        # (L, 6, D)

    wo = st['wo'].astype(jnp.bfloat16)
    w1 = st['w1'].astype(jnp.bfloat16)
    w2 = st['w2'].astype(jnp.bfloat16)
    b1 = st['b1'].astype(jnp.float32)

    args = [src]
    in_specs = [pl.BlockSpec((TB, S, D), lambda b, l: (b, 0, 0))]
    if use_mask:
        args.append(mask.astype(jnp.float32))
        in_specs.append(pl.BlockSpec((S, S), lambda b, l: (0, 0)))
    layer_map = lambda b, l: (l, 0, 0)
    for arr in (wqkv, bqkv, wo, w1, b1, w2, vecs):
        args.append(arr)
        in_specs.append(pl.BlockSpec((1,) + arr.shape[1:], layer_map))
    if use_final_norm:
        g, bta = norm
        args += [g.astype(jnp.float32), bta.astype(jnp.float32)]
        in_specs += [pl.BlockSpec((1, D), lambda b, l: (0, 0)),
                     pl.BlockSpec((1, D), lambda b, l: (0, 0))]

    if vmem_limit_bytes is None:
        vmem_limit_bytes = _default_vmem_limit()

    kernel = functools.partial(
        _stacked_encoder_kernel, num_heads=H, num_layers=L,
        use_mask=use_mask, use_final_norm=use_final_norm,
        kv_block=KV, ff_block=FC)

    return pl.pallas_call(
        kernel,
        out_shape=jax.ShapeDtypeStruct((B, S, D), src.dtype),
        grid_spec=pltpu.PrefetchScalarGridSpec(
            num_scalar_prefetch=0,
            grid=(B // TB, L),
            in_specs=in_specs,
            out_specs=pl.BlockSpec((TB, S, D), lambda b, l: (b, 0, 0)),
            scratch_shapes=[pltpu.VMEM((TB, S, D), jnp.float32)],
        ),
        compiler_params=pltpu.CompilerParams(
            dimension_semantics=("parallel", "arbitrary"),
            vmem_limit_bytes=int(vmem_limit_bytes),
        ),
    )(*args)


# ----------------------------------------------------------------------------
# Parameter construction (synthetic, layer-stacked)
# ----------------------------------------------------------------------------
def make_params(key, num_layers, d_model, num_heads, dim_ff, final_norm=True):
    del num_heads  # head split happens inside the kernel
    D, F, L = d_model, dim_ff, num_layers
    ks = jax.random.split(key, 8)
    s = 0.02
    stacked = dict(
        wqkv=(s * jax.random.normal(ks[0], (L, D, 3 * D))).astype(jnp.bfloat16),
        bqkv=(0.01 * jax.random.normal(ks[1], (L, 1, 3 * D))).astype(jnp.float32),
        wo=(s * jax.random.normal(ks[2], (L, D, D))).astype(jnp.bfloat16),
        bo=(0.01 * jax.random.normal(ks[3], (L, 1, D))).astype(jnp.float32),
        w1=(s * jax.random.normal(ks[4], (L, D, F))).astype(jnp.bfloat16),
        b1=(0.01 * jax.random.normal(ks[5], (L, 1, F))).astype(jnp.float32),
        w2=(s * jax.random.normal(ks[6], (L, F, D))).astype(jnp.bfloat16),
        b2=(0.01 * jax.random.normal(ks[7], (L, 1, D))).astype(jnp.float32),
        ln1_g=jnp.ones((L, 1, D), jnp.float32),
        ln1_b=jnp.zeros((L, 1, D), jnp.float32),
        ln2_g=jnp.ones((L, 1, D), jnp.float32),
        ln2_b=jnp.zeros((L, 1, D), jnp.float32),
    )
    norm = ((jnp.ones((1, D), jnp.float32), jnp.zeros((1, D), jnp.float32))
            if final_norm else None)
    return {'stacked': stacked, 'norm': norm}


# ----------------------------------------------------------------------------
# Pure-JAX reference (f32) for correctness checking
# ----------------------------------------------------------------------------
def reference_forward(x, params, mask, num_heads):
    st = params['stacked']
    L = st['wqkv'].shape[0]
    B, S, D = x.shape
    H = num_heads
    Dh = D // H
    scale = 1.0 / math.sqrt(Dh)

    def ln(h, g, b):
        mu = jnp.mean(h, axis=-1, keepdims=True)
        var = jnp.mean(jnp.square(h - mu), axis=-1, keepdims=True)
        return (h - mu) * jax.lax.rsqrt(var + 1e-5) * g + b

    out = x.astype(jnp.float32)
    for l in range(L):
        qkv = out @ st['wqkv'][l].astype(jnp.float32) + st['bqkv'][l]
        q = qkv[..., :D].reshape(B, S, H, Dh)
        k = qkv[..., D:2 * D].reshape(B, S, H, Dh)
        v = qkv[..., 2 * D:].reshape(B, S, H, Dh)
        sc = jnp.einsum('bqhd,bkhd->bhqk', q, k) * scale
        if mask is not None:
            sc = sc + mask[None, None, :, :]
        p = jax.nn.softmax(sc, axis=-1)
        ctx = jnp.einsum('bhqk,bkhd->bqhd', p, v).reshape(B, S, D)
        attn = ctx @ st['wo'][l].astype(jnp.float32) + st['bo'][l]
        h1 = ln(out + attn, st['ln1_g'][l], st['ln1_b'][l])
        f = jnp.maximum(h1 @ st['w1'][l].astype(jnp.float32) + st['b1'][l], 0.0)
        f = f @ st['w2'][l].astype(jnp.float32) + st['b2'][l]
        out = ln(h1 + f, st['ln2_g'][l], st['ln2_b'][l])
    if params.get('norm') is not None:
        g, b = params['norm']
        out = ln(out, g, b)
    return out


# ----------------------------------------------------------------------------
if __name__ == "__main__":
    B, S, D = 2, 8, 32           # batch, seq, d_model
    H, F = 4, 64                 # num_heads, dim_feedforward
    NUM_LAYERS = 2

    key = jax.random.PRNGKey(0)
    kx, kp = jax.random.split(key)
    x = jax.random.normal(kx, (B, S, D), dtype=jnp.float32)
    params = make_params(kp, NUM_LAYERS, D, H, F, final_norm=True)

    # ---- no mask (mask=None): mask add compiled out ----
    out = replica_transformer_encoder(x, params, mask=None, num_heads=H)
    out = jax.block_until_ready(out)
    assert out.shape == (B, S, D) and out.dtype == jnp.float32
    assert bool(jnp.all(jnp.isfinite(out)))
    ref = reference_forward(x, params, None, H)
    err = float(jnp.max(jnp.abs(out - ref)))
    assert err < 7.5e-2, f"no-mask max abs error {err}"

    # ---- additive causal mask path ----
    causal = jnp.where(jnp.arange(S)[None, :] <= jnp.arange(S)[:, None],
                       0.0, -1e9).astype(jnp.float32)
    out_m = jax.block_until_ready(
        replica_transformer_encoder(x, params, mask=causal, num_heads=H))
    assert bool(jnp.all(jnp.isfinite(out_m)))
    ref_m = reference_forward(x, params, causal, H)
    err_m = float(jnp.max(jnp.abs(out_m - ref_m)))
    assert err_m < 7.5e-2, f"masked max abs error {err_m}"

    print("KERNEL_OK")
</pallas_src>

<mosaic_0001>
module attributes {stable_mosaic.version = 11 : i64} {
  func.func @_stacked_encoder_kernel(%arg0: i32, %arg1: i32, %arg2: memref<2x8x32xf32, #tpu.memory_space<vmem>>, %arg3: memref<1x32x96xbf16, #tpu.memory_space<vmem>>, %arg4: memref<1x1x96xf32, #tpu.memory_space<vmem>>, %arg5: memref<1x32x32xbf16, #tpu.memory_space<vmem>>, %arg6: memref<1x32x64xbf16, #tpu.memory_space<vmem>>, %arg7: memref<1x1x64xf32, #tpu.memory_space<vmem>>, %arg8: memref<1x64x32xbf16, #tpu.memory_space<vmem>>, %arg9: memref<1x6x32xf32, #tpu.memory_space<vmem>>, %arg10: memref<1x32xf32, #tpu.memory_space<vmem>>, %arg11: memref<1x32xf32, #tpu.memory_space<vmem>>, %arg12: memref<2x8x32xf32, #tpu.memory_space<vmem>>, %arg13: memref<2x8x32xf32, #tpu.memory_space<vmem>>) attributes {dimension_semantics = [#tpu.dimension_semantics<parallel>, #tpu.dimension_semantics<arbitrary>], iteration_bounds = array<i64: 1, 2>, scalar_prefetch = 0 : i64, scratch_operands = 1 : i64, tpu.core_type = #tpu.core_type<tc>, window_params = [{transform_indices = @transform_0, window_bounds = array<i64: 2, 8, 32>}, {transform_indices = @transform_1, window_bounds = array<i64: 1, 32, 96>}, {transform_indices = @transform_2, window_bounds = array<i64: 1, 1, 96>}, {transform_indices = @transform_3, window_bounds = array<i64: 1, 32, 32>}, {transform_indices = @transform_4, window_bounds = array<i64: 1, 32, 64>}, {transform_indices = @transform_5, window_bounds = array<i64: 1, 1, 64>}, {transform_indices = @transform_6, window_bounds = array<i64: 1, 64, 32>}, {transform_indices = @transform_7, window_bounds = array<i64: 1, 6, 32>}, {pipeline_mode = #tpu.pipeline_mode<synchronous>, transform_indices = @transform_8, window_bounds = array<i64: 1, 32>}, {pipeline_mode = #tpu.pipeline_mode<synchronous>, transform_indices = @transform_9, window_bounds = array<i64: 1, 32>}, {transform_indices = @transform_10, window_bounds = array<i64: 2, 8, 32>}]} {
    %c0_i32 = arith.constant 0 : i32
    %0 = arith.cmpi eq, %arg1, %c0_i32 : i32
    %1 = arith.extui %0 : i1 to i32
    %c0_i32_0 = arith.constant 0 : i32
    %2 = arith.cmpi ne, %1, %c0_i32_0 : i32
    scf.if %2 {
      %c0_50 = arith.constant 0 : index
      %c0_51 = arith.constant 0 : index
      %c0_52 = arith.constant 0 : index
      %136 = vector.load %arg2[%c0_50, %c0_51, %c0_52] : memref<2x8x32xf32, #tpu.memory_space<vmem>>, vector<2x8x32xf32>
      %c0_53 = arith.constant 0 : index
      %c0_54 = arith.constant 0 : index
      %c0_55 = arith.constant 0 : index
      %137 = vector.load %arg13[%c0_53, %c0_54, %c0_55] : memref<2x8x32xf32, #tpu.memory_space<vmem>>, vector<2x8x32xf32>
      tpu.vector_store %arg13[%c0_53, %c0_54, %c0_55], %136 {strides = array<i32>} : memref<2x8x32xf32, #tpu.memory_space<vmem>>, vector<2x8x32xf32>,
    } else {
    }
    %c0 = arith.constant 0 : index
    %c0_1 = arith.constant 0 : index
    %c0_2 = arith.constant 0 : index
    %3 = vector.load %arg13[%c0, %c0_1, %c0_2] : memref<2x8x32xf32, #tpu.memory_space<vmem>>, vector<2x8x32xf32>
    %4 = vector.shape_cast %3 : vector<2x8x32xf32> to vector<16x32xf32>
    %5 = arith.truncf %4 : vector<16x32xf32> to vector<16x32xbf16>
    %c0_3 = arith.constant 0 : index
    %c0_4 = arith.constant 0 : index
    %c0_5 = arith.constant 0 : index
    %6 = vector.load %arg9[%c0_3, %c0_4, %c0_5] : memref<1x6x32xf32, #tpu.memory_space<vmem>>, vector<1x6x32xf32>
    %7 = vector.shape_cast %6 : vector<1x6x32xf32> to vector<6x32xf32>
    %8 = vector.extract_strided_slice %7 {offsets = [0, 0], sizes = [1, 32], strides = [1, 1]} : vector<6x32xf32> to vector<1x32xf32>
    %9 = vector.extract_strided_slice %7 {offsets = [1, 0], sizes = [1, 32], strides = [1, 1]} : vector<6x32xf32> to vector<1x32xf32>
    %10 = vector.extract_strided_slice %7 {offsets = [2, 0], sizes = [1, 32], strides = [1, 1]} : vector<6x32xf32> to vector<1x32xf32>
    %11 = vector.extract_strided_slice %7 {offsets = [3, 0], sizes = [1, 32], strides = [1, 1]} : vector<6x32xf32> to vector<1x32xf32>
    %12 = vector.extract_strided_slice %7 {offsets = [4, 0], sizes = [1, 32], strides = [1, 1]} : vector<6x32xf32> to vector<1x32xf32>
    %13 = vector.extract_strided_slice %7 {offsets = [5, 0], sizes = [1, 32], strides = [1, 1]} : vector<6x32xf32> to vector<1x32xf32>
    %c0_6 = arith.constant 0 : index
    %c0_7 = arith.constant 0 : index
    %c0_8 = arith.constant 0 : index
    %14 = vector.load %arg3[%c0_6, %c0_7, %c0_8] : memref<1x32x96xbf16, #tpu.memory_space<vmem>>, vector<1x32x96xbf16>
    %15 = vector.shape_cast %14 : vector<1x32x96xbf16> to vector<32x96xbf16>
    %cst = arith.constant dense<0.000000e+00> : vector<16x96xf32>
    %16 = tpu.matmul %5, %15, %cst {dimension_numbers = #tpu.dot_dimension_numbers<[1], [0], [0], [1], [0, 0, 1, 1], [], []>} : vector<16x32xbf16>, vector<32x96xbf16>, vector<16x96xf32> -> vector<16x96xf32>
    %c0_9 = arith.constant 0 : index
    %c0_10 = arith.constant 0 : index
    %c0_11 = arith.constant 0 : index
    %17 = vector.load %arg4[%c0_9, %c0_10, %c0_11] : memref<1x1x96xf32, #tpu.memory_space<vmem>>, vector<1x1x96xf32>
    %18 = vector.shape_cast %17 : vector<1x1x96xf32> to vector<1x96xf32>
    %19 = vector.broadcast %18 : vector<1x96xf32> to vector<16x96xf32>
    %20 = arith.addf %16, %19 : vector<16x96xf32>
    %21 = arith.truncf %20 : vector<16x96xf32> to vector<16x96xbf16>
    %22 = vector.extract_strided_slice %21 {offsets = [0, 0], sizes = [16, 32], strides = [1, 1]} : vector<16x96xbf16> to vector<16x32xbf16>
    %23 = vector.shape_cast %22 : vector<16x32xbf16> to vector<2x8x4x8xbf16>
    %24 = tpu.transpose %23, [0, 2, 1, 3] : vector<2x8x4x8xbf16> -> vector<2x4x8x8xbf16>
    %25 = vector.shape_cast %24 : vector<2x4x8x8xbf16> to vector<8x8x8xbf16>
    %26 = vector.extract_strided_slice %21 {offsets = [0, 32], sizes = [16, 32], strides = [1, 1]} : vector<16x96xbf16> to vector<16x32xbf16>
    %27 = vector.shape_cast %26 : vector<16x32xbf16> to vector<2x8x4x8xbf16>
    %28 = tpu.transpose %27, [0, 2, 1, 3] : vector<2x8x4x8xbf16> -> vector<2x4x8x8xbf16>
    %29 = vector.shape_cast %28 : vector<2x4x8x8xbf16> to vector<8x8x8xbf16>
    %30 = vector.extract_strided_slice %21 {offsets = [0, 64], sizes = [16, 32], strides = [1, 1]} : vector<16x96xbf16> to vector<16x32xbf16>
    %31 = vector.shape_cast %30 : vector<16x32xbf16> to vector<2x8x4x8xbf16>
    %32 = tpu.transpose %31, [0, 2, 1, 3] : vector<2x8x4x8xbf16> -> vector<2x4x8x8xbf16>
    %33 = vector.shape_cast %32 : vector<2x4x8x8xbf16> to vector<8x8x8xbf16>
    %cst_12 = arith.constant -1.000000e+30 : f32
    %34 = vector.broadcast %cst_12 : f32 to vector<8x8x1xf32>
    %cst_13 = arith.constant 0.000000e+00 : f32
    %35 = vector.broadcast %cst_13 : f32 to vector<8x8x1xf32>
    %cst_14 = arith.constant 0.000000e+00 : f32
    %36 = vector.broadcast %cst_14 : f32 to vector<8x8x8xf32>
    "tpu.trace_start"() <{level = 10 : i32, message = "nqd,nkd->nqk"}> : () -> ()
    %cst_15 = arith.constant dense<0.000000e+00> : vector<8x8x8xf32>
    %37 = tpu.matmul %25, %29, %cst_15 {dimension_numbers = #tpu.dot_dimension_numbers<[2], [2], [1], [1], [0, 0, 0, 1, 1, 1], [0], [0]>} : vector<8x8x8xbf16>, vector<8x8x8xbf16>, vector<8x8x8xf32> -> vector<8x8x8xf32>
    "tpu.trace_stop"() : () -> ()
    %cst_16 = arith.constant dense<0xFF800000> : vector<8x8xf32>
    %38 = vector.multi_reduction <maximumf>, %37, %cst_16 [2] : vector<8x8x8xf32> to vector<8x8xf32>
    %39 = vector.shape_cast %38 : vector<8x8xf32> to vector<8x8x1xf32>
    %40 = arith.maximumf %34, %39 : vector<8x8x1xf32>
    %41 = arith.subf %34, %40 : vector<8x8x1xf32>
    %42 = math.exp %41 : vector<8x8x1xf32>
    %43 = vector.broadcast %40 : vector<8x8x1xf32> to vector<8x8x8xf32>
    %44 = arith.subf %37, %43 : vector<8x8x8xf32>
    %45 = math.exp %44 : vector<8x8x8xf32>
    %46 = arith.mulf %42, %35 : vector<8x8x1xf32>
    %cst_17 = arith.constant dense<0.000000e+00> : vector<8x8xf32>
    %47 = vector.multi_reduction <add>, %45, %cst_17 [2] : vector<8x8x8xf32> to vector<8x8xf32>
    %48 = vector.shape_cast %47 : vector<8x8xf32> to vector<8x8x1xf32>
    %49 = arith.addf %46, %48 : vector<8x8x1xf32>
    %50 = vector.broadcast %42 : vector<8x8x1xf32> to vector<8x8x8xf32>
    %51 = arith.mulf %50, %36 : vector<8x8x8xf32>
    %52 = arith.truncf %45 : vector<8x8x8xf32> to vector<8x8x8xbf16>
    "tpu.trace_start"() <{level = 10 : i32, message = "nqk,nkd->nqd"}> : () -> ()
    %cst_18 = arith.constant dense<0.000000e+00> : vector<8x8x8xf32>
    %53 = tpu.matmul %52, %33, %cst_18 {dimension_numbers = #tpu.dot_dimension_numbers<[2], [1], [1], [2], [0, 0, 0, 1, 1, 2], [0], [0]>} : vector<8x8x8xbf16>, vector<8x8x8xbf16>, vector<8x8x8xf32> -> vector<8x8x8xf32>
    "tpu.trace_stop"() : () -> ()
    %54 = arith.addf %51, %53 : vector<8x8x8xf32>
    %55 = tpu.reciprocal %49 {approx = true} : vector<8x8x1xf32> -> vector<8x8x1xf32>
    %56 = vector.broadcast %55 : vector<8x8x1xf32> to vector<8x8x8xf32>
    %57 = arith.mulf %54, %56 : vector<8x8x8xf32>
    %58 = vector.shape_cast %57 : vector<8x8x8xf32> to vector<2x4x8x8xf32>
    %59 = tpu.transpose %58, [0, 2, 1, 3] : vector<2x4x8x8xf32> -> vector<2x8x4x8xf32>
    %60 = vector.shape_cast %59 : vector<2x8x4x8xf32> to vector<16x32xf32>
    %61 = arith.truncf %60 : vector<16x32xf32> to vector<16x32xbf16>
    %c0_19 = arith.constant 0 : index
    %c0_20 = arith.constant 0 : index
    %c0_21 = arith.constant 0 : index
    %62 = vector.load %arg5[%c0_19, %c0_20, %c0_21] : memref<1x32x32xbf16, #tpu.memory_space<vmem>>, vector<1x32x32xbf16>
    %63 = vector.shape_cast %62 : vector<1x32x32xbf16> to vector<32x32xbf16>
    %cst_22 = arith.constant dense<0.000000e+00> : vector<16x32xf32>
    %64 = tpu.matmul %61, %63, %cst_22 {dimension_numbers = #tpu.dot_dimension_numbers<[1], [0], [0], [1], [0, 0, 1, 1], [], []>} : vector<16x32xbf16>, vector<32x32xbf16>, vector<16x32xf32> -> vector<16x32xf32>
    %65 = vector.broadcast %8 : vector<1x32xf32> to vector<16x32xf32>
    %66 = arith.addf %64, %65 : vector<16x32xf32>
    %67 = arith.addf %4, %66 : vector<16x32xf32>
    %cst_23 = arith.constant dense<0.000000e+00> : vector<16xf32>
    %68 = vector.multi_reduction <add>, %67, %cst_23 [1] : vector<16x32xf32> to vector<16xf32>
    %69 = vector.shape_cast %68 : vector<16xf32> to vector<16x1xf32>
    %cst_24 = arith.constant 3.200000e+01 : f32
    %70 = vector.broadcast %cst_24 : f32 to vector<16x1xf32>
    %71 = arith.divf %69, %70 : vector<16x1xf32>
    %72 = vector.broadcast %71 : vector<16x1xf32> to vector<16x32xf32>
    %73 = arith.subf %67, %72 : vector<16x32xf32>
    %74 = arith.mulf %73, %73 : vector<16x32xf32>
    %cst_25 = arith.constant dense<0.000000e+00> : vector<16xf32>
    %75 = vector.multi_reduction <add>, %74, %cst_25 [1] : vector<16x32xf32> to vector<16xf32>
    %76 = vector.shape_cast %75 : vector<16xf32> to vector<16x1xf32>
    %cst_26 = arith.constant 3.200000e+01 : f32
    %77 = vector.broadcast %cst_26 : f32 to vector<16x1xf32>
    %78 = arith.divf %76, %77 : vector<16x1xf32>
    %79 = vector.broadcast %71 : vector<16x1xf32> to vector<16x32xf32>
    %80 = arith.subf %67, %79 : vector<16x32xf32>
    %cst_27 = arith.constant 9.99999974E-6 : f32
    %81 = vector.broadcast %cst_27 : f32 to vector<16x1xf32>
    %82 = arith.addf %78, %81 : vector<16x1xf32>
    %83 = math.rsqrt %82 : vector<16x1xf32>
    %84 = vector.broadcast %83 : vector<16x1xf32> to vector<16x32xf32>
    %85 = arith.mulf %80, %84 : vector<16x32xf32>
    %86 = vector.broadcast %10 : vector<1x32xf32> to vector<16x32xf32>
    %87 = arith.mulf %85, %86 : vector<16x32xf32>
    %88 = vector.broadcast %11 : vector<1x32xf32> to vector<16x32xf32>
    %89 = arith.addf %87, %88 : vector<16x32xf32>
    %90 = arith.truncf %89 : vector<16x32xf32> to vector<16x32xbf16>
    %c0_28 = arith.constant 0 : index
    %c0_29 = arith.constant 0 : index
    %c0_30 = arith.constant 0 : index
    %91 = vector.load %arg7[%c0_28, %c0_29, %c0_30] : memref<1x1x64xf32, #tpu.memory_space<vmem>>, vector<1x1x64xf32>
    %92 = vector.shape_cast %91 : vector<1x1x64xf32> to vector<1x64xf32>
    %cst_31 = arith.constant 0.000000e+00 : f32
    %93 = vector.broadcast %cst_31 : f32 to vector<16x32xf32>
    %c0_32 = arith.constant 0 : index
    %c0_33 = arith.constant 0 : index
    %c0_34 = arith.constant 0 : index
    %94 = vector.load %arg6[%c0_32, %c0_33, %c0_34] : memref<1x32x64xbf16, #tpu.memory_space<vmem>>, vector<1x32x64xbf16>
    %95 = vector.shape_cast %94 : vector<1x32x64xbf16> to vector<32x64xbf16>
    %cst_35 = arith.constant dense<0.000000e+00> : vector<16x64xf32>
    %96 = tpu.matmul %90, %95, %cst_35 {dimension_numbers = #tpu.dot_dimension_numbers<[1], [0], [0], [1], [0, 0, 1, 1], [], []>} : vector<16x32xbf16>, vector<32x64xbf16>, vector<16x64xf32> -> vector<16x64xf32>
    %97 = vector.broadcast %92 : vector<1x64xf32> to vector<16x64xf32>
    %98 = arith.addf %96, %97 : vector<16x64xf32>
    %cst_36 = arith.constant 0.000000e+00 : f32
    %99 = vector.broadcast %cst_36 : f32 to vector<16x64xf32>
    %100 = arith.maximumf %98, %99 : vector<16x64xf32>
    %101 = arith.truncf %100 : vector<16x64xf32> to vector<16x64xbf16>
    %c0_37 = arith.constant 0 : index
    %c0_38 = arith.constant 0 : index
    %c0_39 = arith.constant 0 : index
    %102 = vector.load %arg8[%c0_37, %c0_38, %c0_39] : memref<1x64x32xbf16, #tpu.memory_space<vmem>>, vector<1x64x32xbf16>
    %103 = vector.shape_cast %102 : vector<1x64x32xbf16> to vector<64x32xbf16>
    %cst_40 = arith.constant dense<0.000000e+00> : vector<16x32xf32>
    %104 = tpu.matmul %101, %103, %cst_40 {dimension_numbers = #tpu.dot_dimension_numbers<[1], [0], [0], [1], [0, 0, 1, 1], [], []>} : vector<16x64xbf16>, vector<64x32xbf16>, vector<16x32xf32> -> vector<16x32xf32>
    %105 = arith.addf %93, %104 : vector<16x32xf32>
    %106 = vector.broadcast %9 : vector<1x32xf32> to vector<16x32xf32>
    %107 = arith.addf %105, %106 : vector<16x32xf32>
    %108 = arith.addf %89, %107 : vector<16x32xf32>
    %cst_41 = arith.constant dense<0.000000e+00> : vector<16xf32>
    %109 = vector.multi_reduction <add>, %108, %cst_41 [1] : vector<16x32xf32> to vector<16xf32>
    %110 = vector.shape_cast %109 : vector<16xf32> to vector<16x1xf32>
    %cst_42 = arith.constant 3.200000e+01 : f32
    %111 = vector.broadcast %cst_42 : f32 to vector<16x1xf32>
    %112 = arith.divf %110, %111 : vector<16x1xf32>
    %113 = vector.broadcast %112 : vector<16x1xf32> to vector<16x32xf32>
    %114 = arith.subf %108, %113 : vector<16x32xf32>
    %115 = arith.mulf %114, %114 : vector<16x32xf32>
    %cst_43 = arith.constant dense<0.000000e+00> : vector<16xf32>
    %116 = vector.multi_reduction <add>, %115, %cst_43 [1] : vector<16x32xf32> to vector<16xf32>
    %117 = vector.shape_cast %116 : vector<16xf32> to vector<16x1xf32>
    %cst_44 = arith.constant 3.200000e+01 : f32
    %118 = vector.broadcast %cst_44 : f32 to vector<16x1xf32>
    %119 = arith.divf %117, %118 : vector<16x1xf32>
    %120 = vector.broadcast %112 : vector<16x1xf32> to vector<16x32xf32>
    %121 = arith.subf %108, %120 : vector<16x32xf32>
    %cst_45 = arith.constant 9.99999974E-6 : f32
    %122 = vector.broadcast %cst_45 : f32 to vector<16x1xf32>
    %123 = arith.addf %119, %122 : vector<16x1xf32>
    %124 = math.rsqrt %123 : vector<16x1xf32>
    %125 = vector.broadcast %124 : vector<16x1xf32> to vector<16x32xf32>
    %126 = arith.mulf %121, %125 : vector<16x32xf32>
    %127 = vector.broadcast %12 : vector<1x32xf32> to vector<16x32xf32>
    %128 = arith.mulf %126, %127 : vector<16x32xf32>
    %129 = vector.broadcast %13 : vector<1x32xf32> to vector<16x32xf32>
    %130 = arith.addf %128, %129 : vector<16x32xf32>
    %131 = vector.shape_cast %130 : vector<16x32xf32> to vector<2x8x32xf32>
    %c0_46 = arith.constant 0 : index
    %c0_47 = arith.constant 0 : index
    %c0_48 = arith.constant 0 : index
    %132 = vector.load %arg13[%c0_46, %c0_47, %c0_48] : memref<2x8x32xf32, #tpu.memory_space<vmem>>, vector<2x8x32xf32>
    tpu.vector_store %arg13[%c0_46, %c0_47, %c0_48], %131 {strides = array<i32>} : memref<2x8x32xf32, #tpu.memory_space<vmem>>, vector<2x8x32xf32>,
    %c1_i32 = arith.constant 1 : i32
    %133 = arith.cmpi eq, %arg1, %c1_i32 : i32
    %134 = arith.extui %133 : i1 to i32
    %c0_i32_49 = arith.constant 0 : i32
    %135 = arith.cmpi ne, %134, %c0_i32_49 : i32
    scf.if %135 {
      %c0_50 = arith.constant 0 : index
      %c0_51 = arith.constant 0 : index
      %136 = vector.load %arg10[%c0_50, %c0_51] : memref<1x32xf32, #tpu.memory_space<vmem>>, vector<1x32xf32>
      %c0_52 = arith.constant 0 : index
      %c0_53 = arith.constant 0 : index
      %137 = vector.load %arg11[%c0_52, %c0_53] : memref<1x32xf32, #tpu.memory_space<vmem>>, vector<1x32xf32>
      %cst_54 = arith.constant dense<0.000000e+00> : vector<16xf32>
      %138 = vector.multi_reduction <add>, %130, %cst_54 [1] : vector<16x32xf32> to vector<16xf32>
      %139 = vector.shape_cast %138 : vector<16xf32> to vector<16x1xf32>
      %cst_55 = arith.constant 3.200000e+01 : f32
      %140 = vector.broadcast %cst_55 : f32 to vector<16x1xf32>
      %141 = arith.divf %139, %140 : vector<16x1xf32>
      %142 = vector.broadcast %141 : vector<16x1xf32> to vector<16x32xf32>
      %143 = arith.subf %130, %142 : vector<16x32xf32>
      %144 = arith.mulf %143, %143 : vector<16x32xf32>
      %cst_56 = arith.constant dense<0.000000e+00> : vector<16xf32>
      %145 = vector.multi_reduction <add>, %144, %cst_56 [1] : vector<16x32xf32> to vector<16xf32>
      %146 = vector.shape_cast %145 : vector<16xf32> to vector<16x1xf32>
      %cst_57 = arith.constant 3.200000e+01 : f32
      %147 = vector.broadcast %cst_57 : f32 to vector<16x1xf32>
      %148 = arith.divf %146, %147 : vector<16x1xf32>
      %149 = vector.broadcast %141 : vector<16x1xf32> to vector<16x32xf32>
      %150 = arith.subf %130, %149 : vector<16x32xf32>
      %cst_58 = arith.constant 9.99999974E-6 : f32
      %151 = vector.broadcast %cst_58 : f32 to vector<16x1xf32>
      %152 = arith.addf %148, %151 : vector<16x1xf32>
      %153 = math.rsqrt %152 : vector<16x1xf32>
      %154 = vector.broadcast %153 : vector<16x1xf32> to vector<16x32xf32>
      %155 = arith.mulf %150, %154 : vector<16x32xf32>
      %156 = vector.broadcast %136 : vector<1x32xf32> to vector<16x32xf32>
      %157 = arith.mulf %155, %156 : vector<16x32xf32>
      %158 = vector.broadcast %137 : vector<1x32xf32> to vector<16x32xf32>
      %159 = arith.addf %157, %158 : vector<16x32xf32>
      %160 = vector.shape_cast %159 : vector<16x32xf32> to vector<2x8x32xf32>
      %c0_59 = arith.constant 0 : index
      %c0_60 = arith.constant 0 : index
      %c0_61 = arith.constant 0 : index
      %161 = vector.load %arg12[%c0_59, %c0_60, %c0_61] : memref<2x8x32xf32, #tpu.memory_space<vmem>>, vector<2x8x32xf32>
      tpu.vector_store %arg12[%c0_59, %c0_60, %c0_61], %160 {strides = array<i32>} : memref<2x8x32xf32, #tpu.memory_space<vmem>>, vector<2x8x32xf32>,
    } else {
    }
    return
  }
  func.func @transform_0(%arg0: i32, %arg1: i32) -> (i32, i32, i32) {
    %c0_i32 = arith.constant 0 : i32
    %c0_i32_0 = arith.constant 0 : i32
    %c0_i32_1 = arith.constant 0 : i32
    return %arg0, %c0_i32, %c0_i32_0 : i32, i32, i32
  }
  func.func @transform_1(%arg0: i32, %arg1: i32) -> (i32, i32, i32) {
    %c0_i32 = arith.constant 0 : i32
    %c0_i32_0 = arith.constant 0 : i32
    %c0_i32_1 = arith.constant 0 : i32
    return %arg1, %c0_i32, %c0_i32_0 : i32, i32, i32
  }
  func.func @transform_2(%arg0: i32, %arg1: i32) -> (i32, i32, i32) {
    %c0_i32 = arith.constant 0 : i32
    %c0_i32_0 = arith.constant 0 : i32
    %c0_i32_1 = arith.constant 0 : i32
    return %arg1, %c0_i32, %c0_i32_0 : i32, i32, i32
  }
  func.func @transform_3(%arg0: i32, %arg1: i32) -> (i32, i32, i32) {
    %c0_i32 = arith.constant 0 : i32
    %c0_i32_0 = arith.constant 0 : i32
    %c0_i32_1 = arith.constant 0 : i32
    return %arg1, %c0_i32, %c0_i32_0 : i32, i32, i32
  }
  func.func @transform_4(%arg0: i32, %arg1: i32) -> (i32, i32, i32) {
    %c0_i32 = arith.constant 0 : i32
    %c0_i32_0 = arith.constant 0 : i32
    %c0_i32_1 = arith.constant 0 : i32
    return %arg1, %c0_i32, %c0_i32_0 : i32, i32, i32
  }
  func.func @transform_5(%arg0: i32, %arg1: i32) -> (i32, i32, i32) {
    %c0_i32 = arith.constant 0 : i32
    %c0_i32_0 = arith.constant 0 : i32
    %c0_i32_1 = arith.constant 0 : i32
    return %arg1, %c0_i32, %c0_i32_0 : i32, i32, i32
  }
  func.func @transform_6(%arg0: i32, %arg1: i32) -> (i32, i32, i32) {
    %c0_i32 = arith.constant 0 : i32
    %c0_i32_0 = arith.constant 0 : i32
    %c0_i32_1 = arith.constant 0 : i32
    return %arg1, %c0_i32, %c0_i32_0 : i32, i32, i32
  }
  func.func @transform_7(%arg0: i32, %arg1: i32) -> (i32, i32, i32) {
    %c0_i32 = arith.constant 0 : i32
    %c0_i32_0 = arith.constant 0 : i32
    %c0_i32_1 = arith.constant 0 : i32
    return %arg1, %c0_i32, %c0_i32_0 : i32, i32, i32
  }
  func.func @transform_8(%arg0: i32, %arg1: i32) -> (i32, i32) {
    %c0_i32 = arith.constant 0 : i32
    %c0_i32_0 = arith.constant 0 : i32
    %c0_i32_1 = arith.constant 0 : i32
    return %c0_i32, %c0_i32_0 : i32, i32
  }
  func.func @transform_9(%arg0: i32, %arg1: i32) -> (i32, i32) {
    %c0_i32 = arith.constant 0 : i32
    %c0_i32_0 = arith.constant 0 : i32
    %c0_i32_1 = arith.constant 0 : i32
    return %c0_i32, %c0_i32_0 : i32, i32
  }
  func.func @transform_10(%arg0: i32, %arg1: i32) -> (i32, i32, i32) {
    %c0_i32 = arith.constant 0 : i32
    %c0_i32_0 = arith.constant 0 : i32
    %c0_i32_1 = arith.constant 0 : i32
    return %arg0, %c0_i32, %c0_i32_0 : i32, i32, i32
  }
}

</mosaic_0001>

<bundles_post_ra>
// kernel: tpu_custom_call.1
= control target key start
LH: loop header
LB: loop body
LE: loop exit
PB: predicated region body
PF: predicated region fallthrough
CT: control target
= control target key end

     0   :  { %s3737_s0 = inlined_call_operand.hbm [shape: f32[2,8,32], index: 0, kind: input, shape index: {}]   ;;  %s3738_s1 = inlined_call_operand.vmem [shape: bf16[2,32,96], index: 1, kind: input, shape index: {}]   ;;  %s3739_s2 = inlined_call_operand.hbm [shape: f32[2,1,96], index: 2, kind: input, shape index: {}]   ;;  %s3740_s3 = inlined_call_operand.vmem [shape: bf16[2,32,32], index: 3, kind: input, shape index: {}]   ;;  %s3741_s4 = inlined_call_operand.vmem [shape: bf16[2,32,64], index: 4, kind: input, shape index: {}]   ;;  %s3742_s5 = inlined_call_operand.hbm [shape: f32[2,1,64], index: 5, kind: input, shape index: {}]   ;;  %s3743_s6 = inlined_call_operand.vmem [shape: bf16[2,64,32], index: 6, kind: input, shape index: {}]   ;;  %s3744_s7 = inlined_call_operand.vmem [shape: f32[2,6,32], index: 7, kind: input, shape index: {}]   ;;  %s3745_s8 = inlined_call_operand.vmem [shape: f32[1,32], index: 8, kind: input, shape index: {}]   ;;  %s3746_s9 = inlined_call_operand.vmem [shape: f32[1,32], index: 9, kind: input, shape index: {}]   ;;  %s3747_s10 = inlined_call_operand.hbm [shape: f32[2,8,32], index: 10, kind: output, shape index: {}]  }
   0x1   :  { %3752 = sst [smem:[#allocation18_spill]] %s3737_s0 }
   0x2   :  { %3753 = sst [smem:[#allocation19_spill]] %s3739_s2 }
   0x3   :  { %3754 = sst [smem:[#allocation20_spill]] %s3742_s5 }
   0x4   :  { %15 = vsyncpa [#allocation4], 0 }
   0x5   :  { %16 = vsyncpa [#allocation7], 0 }
   0x6   :  { %18 = vsyncpa [#allocation7 + $0x1], 0 }
   0x7   :  { %19 = vsyncpa [#allocation5], 0  ;;  %s3012_s13 = smov 0   ;;  %s3014_s14 = smov 0  }
   0x8   :  { %s3016_s15 = smov 0   ;;  %s3018_s16 = smov 0  }
   0x9   :  { %s3020_s17 = smov 0   ;;  %s3022_s18 = smov 0  }
   0xa LB: > { %3755 = sst [smem:[#allocation13_spill]] %s2923_s14  ;;  %s34_s19 = sadd.s32 1, %s2935_s17  ;;  %s2939_s18 = sphi %s3022_s18, %s25_s18   ;;  %s2935_s17 = sphi %s3020_s17, %s3771_s17   ;;  %s2931_s16 = sphi %s3018_s16, %s3770_s16   ;;  %s2927_s15 = sphi %s3016_s15, %s3769_s15   ;;  %s2923_s14 = sphi %s3014_s14, %s3768_s14   ;;  %s2919_s13 = sphi %s3012_s13, %s3767_s13  }
   0xb   : > { %3756 = sst [smem:[#allocation14_spill]] %s2927_s15  ;;  %s96_s20 = sadd.s32 1, %s2927_s15 }
   0xc   : > { %3757 = sst [smem:[#allocation15_spill]] %s2935_s17  ;;  %p35_p0 = scmp.ge.s32.totalorder %s34_s19, 2 }
   0xd   : > { %p103_p1 = scmp.ne.s32.totalorder %s2927_s15, %s2923_s14  ;;  %p104_p2 = scmp.eq.s32.totalorder %s2939_s18, 0 }
   0xe   : > { %p109_p3 = scmp.ne.s32.totalorder %s2923_s14, %s2919_s13  ;;  %s3773_s19 = smov (%p35_p0, %s34_s19), 0 }
   0xf   : > { %3758 = sst [smem:[#allocation16_spill]] %s3773_s19  ;;  %p3051_p4 = por %p104_p2, %p103_p1 }
  0x10   : > { %s93_s22 = ssub.s32 %s2935_s17, %s3773_s19  ;;  %p2612_p5 = scmp.lt.s32.totalorder %s2939_s18, 2 }
  0x11   : > { %p94_p6 = scmp.eq.s32.totalorder %s93_s22, 0  ;;  %s362_s23 = sand.u32 1, %s2939_s18  }
  0x12   : > { %s364_s24 = sand.u32 1, %s2927_s15   ;;  %s3761_s2 = sld [smem:[#allocation19_spill]] }
  0x13   : > { %s3061_s25 = scalar_select %p94_p6, %s2927_s15, %s96_s20  }
  0x14   : > { %s365_s30 = scalar_lea.vmem [#allocation6], %s364_s24  ;;  %p3069_p7 = pnand %p2612_p5, %p3051_p4 }
  0x15   : > { %3760 = sst [smem:[#allocation17_spill]] %s3061_s25  ;;  %s372_s11 = sshll.u32 %s365_s30, 4  ;;  %s373_s11 = int_to_ptr.vmem [resolvable:$true] %s372_s11 }
  0x16   : > { %s3074_s22 = sadd.s32 4294967295, %s2939_s18   ;;  %s363_s20 = scalar_lea.sflag [#allocation7], %s362_s23 }
  0x17   : > { %p110_p8 = scmp.eq.s32.totalorder %s3074_s22, 0  ;;  %p2494_p9 = scmp.ge.s32.totalorder %s2939_s18, 1 }
  0x18   : > { %s368_s28 = scalar_lea.hbm %s3761_s2, %s2935_s17  ;;  %p318_p10 = scmp.lt.s32.totalorder %s2939_s18, 3 }
  0x19   : > { %s370_s29 = sshll.u32 %s368_s28, 4  ;;  %p3086_p11 = por %p110_p8, %p109_p3  ;;  %s371_s29 = int_to_ptr.hbm [resolvable:$true] %s370_s29 }
  0x1a   : > { %2607 = dma.hbm_to_vmem [thread:$0]  (!%p3069_p7), %s371_s29, 16, %s373_s11, %s363_s20  }
  0x1b   : > { %s3764_s0 = sld [smem:[#allocation18_spill]]  ;;  %p3093_p12 = pnand %p2494_p9, %p318_p10 }
  0x1c   : > { %s2941_s23 = smov [#allocation3]   ;;  %s3766_s5 = sld [smem:[#allocation20_spill]] }
  0x1d   : > { %p2600_p13 = pneg %p3093_p12  ;;  %s334_s13 = sshll.u32 %s2941_s23, 4  ;;  %s335_s13 = int_to_ptr.vmem [resolvable:$true] %s334_s13 }
  0x1e   : > { %s398_s27 = scalar_lea.vmem [#allocation8], %s364_s24  ;;  %s2942_s19 = smov 128  }
  0x1f   : > { %p2601_p0 = pnand %p2600_p13, %p110_p8  ;;  %s2943_s25 = smov 8  }
  0x21   : > { %s332_s28 = sshll.u32 %s3764_s0, 4  ;;  %s405_s0 = sshll.u32 %s398_s27, 4  ;;  %s333_s28 = int_to_ptr.hbm [resolvable:$true] %s332_s28  ;;  %s406_s0 = int_to_ptr.vmem [resolvable:$true] %s405_s0 }
  0x22   : > { %s401_s2 = scalar_lea.hbm %s3766_s5, %s2935_s17  ;;  %429 = sbr.rel (%p3093_p12) target bundleno = 2297 (0x8f9), region = 60 }
  0x23   : > { %s403_s26 = sshll.u32 %s401_s2, 4  ;;  %s404_s26 = int_to_ptr.hbm [resolvable:$true] %s403_s26 }
  0x24   : > { %2603 = dma.hbm_to_vmem [thread:$0]  (!%p2601_p0), %s333_s28, 256, %s335_s13, [#allocation4], %s2942_s19, %s2942_s19, %s2943_s25  }
  0x25   : > { %2610 = dma.hbm_to_vmem [thread:$0]  (!%p3069_p7), %s404_s26, 16, %s406_s0, %s363_s20  }
  0x27   : > { %2906 = dma.done.wait (%p110_p8), [#allocation4], 256  }
  0x28   : > { %2908 = vsyncadd (%p110_p8), [#allocation4], 4294967040  ;;  %s436_s2 = sand.u32 1, %s3074_s22   ;;  %s438_s24 = sand.u32 1, %s2923_s14  }
  0x29   : > { %s437_s23 = scalar_lea.sflag [#allocation7], %s436_s2  ;;  %s3115_s29 = scalar_lea.vmem [#allocation6], %s438_s24 }
  0x2a   : > { %2910 = dma.done.wait (%p3086_p11), %s437_s23, 32  }
  0x2b   : > { %2912 = vsyncadd (%p3086_p11), %s437_s23, 4294967264  ;;  %p509_p1 = scmp.lt.s32.totalorder %s2931_s16, 1  ;;  %s3146_s20 = scalar_lea.vmem [#allocation8], %s438_s24 }
  0x2c   : > { %p2508_p2 = scmp.ne.s32.totalorder %s2931_s16, 0 }
  0x2d   : > { %s510_s0 = scalar_select %p509_p1, %s2931_s16, 1 }
  0x2f   : > { %s2574_s19 = sshll.u32 %s510_s0, 4  ;;  %s2577_s25 = sshll.u32 %s510_s0, 5 }
  0x30   : > { %s513_s28 = scalar_lea.vmem %s3738_s1, %s2574_s19  ;;  %s3129_s11 = scalar_lea.vmem %s3740_s3, %s2574_s19 }
  0x31   : > { %s3134_s21 = scalar_lea.vmem %s3741_s4, %s2574_s19  ;;  %s3139_s5 = scalar_lea.vmem %s3743_s6, %s2577_s25 }
  0x32   : > { %s2507_s17 = sshll.u32 %s510_s0, 3  ;;  %538 = sbr.rel (%p2508_p2) target bundleno = 58 (0x3a), region = 76 }
  0x33   : > { %s3144_s12 = scalar_lea.vmem %s3744_s7, %s2507_s17 }
  0x37   : > { %v539_v0 = vld [vmem:[#allocation3] sm:$0xff]  ;;  %vm541_vm0 = vcmask 261120   ;;  %v540_v1 = vld [vmem:[#allocation3 + $0x8] sm:$0xff] }
  0x38   : > { %542 = vst.msk [vmem:[#allocation2] sm:$0xff] %vm541_vm0, %v539_v0 }
  0x39   : > { %543 = vst.msk [vmem:[#allocation2 + $0x8] sm:$0xff] %vm541_vm0, %v540_v1 }
  0x3a PF: > { %v2579_v2 = vld [vmem:[%s513_s28 + $0x8] sm:$0xff]  ;;  %v2578_v3 = vld [vmem:[%s513_s28] sm:$0xff]  ;;  %vm568_vm1 = vcmask 261120   ;;  %s2944_s14 = smov 104   ;;  %s2945_s15 = smov 120   ;;  %vm637_vm2 = vcmask 1047556  }
  0x3b   : > { %578 = vmatpush.bf16.msra.mxu0 %v2579_v2  ;;  %v2695_v7 = vld [vmem:[%s3115_s29] ss:$0 sm:$0xff]  ;;  %s2946_s17 = smov 112   ;;  %s2947_s24 = smov 96   ;;  %v2948_v16 = vmov 1983009808  }
  0x3c   : > { %v628_v17 = vunpack.c.l.s4 %v2948_v16  ;;  %v2949_v23 = vmov 1934713408   ;;  %s2950_s29 = smov 64   ;;  %vm1319_vm3 = vcmask 64512   ;;  %vm1603_vm4 = vcmask 1043456   ;;  %s2951_s0 = smov 24  }
  0x3d   : > { %v642_v24 = vunpack.c.l.s4 %v2949_v23  ;;  %s2952_s19 = smov 16   ;;  %s2953_s25 = smov 8   ;;  %vm2024_vm5 = vcmask 130048   ;;  %vm2027_vm6 = vcmask 195584   ;;  %vm2198_vm14 = vcmask 523264  }
  0x3e   : > { %v3171_v21 = vunpack.c.0.s8 %v628_v17  ;;  %p2569_p3 = scmp.ne.s32.totalorder %s2931_s16, 1 }
  0x3f   : > { %v544_v4 = vld [vmem:[#allocation2] sm:$0xff]  ;;  %579 = vmatpush.bf16.msra.mxu0 %v2578_v3  ;;  %v3182_v31 = vunpack.c.0.s8 %v642_v24 }
  0x40   : > { %v545_v5 = vld [vmem:[#allocation2 + $0x8] sm:$0xff] }
  0x41   : > { %v546_v6 = vpack.c.bf16 %v545_v5, %v544_v4 }
  0x43   : > { %2517 = vmatmul.msk.bf16.vlgmr.msra.gmra.mxu0 %vm568_vm1, %v546_v6 }
  0xc0   : > { %v581_v8 = vpop.f32.mrf.mxu0 }
  0xc1   : > { %v582_v9 = vadd.f32 %v2695_v7, %v581_v8 }
  0xc3   : > { %v3151_v10 = vpack.c.bf16 %v582_v9, %v582_v9 }
  0xc5   : > { %598 = vrot.lane.b32.xlu1 %v3151_v10, %s2944_s14  ;;  %590 = vrot.lane.b32.xlu0 %v3151_v10, %s2945_s15  ;;  %v605_v22 = vshrl.u32 %v3151_v10, 16 }
  0xc8   : > { %v583_v11 = vpop.f32.mrf.mxu0 }
  0xc9   : > { %v584_v12 = vadd.f32 %v2695_v7, %v583_v11 }
  0xcb   : > { %v3155_v13 = vpack.c.bf16 %v584_v12, %v584_v12 }
  0xcd   : > { %596 = vrot.lane.b32.xlu2 %v3155_v13, %s2946_s17  ;;  %592 = vrot.lane.b32.xlu1 %v3155_v13, %s2945_s15 }
  0xce   : > { %594 = vrot.lane.b32.xlu0 %v3151_v10, %s2946_s17 }
  0xd5   : > { %600 = vrot.lane.b32.xlu2 %v3155_v13, %s2944_s14 }
  0xd6   : > { %831 = vrot.lane.b32.xlu0 %v3151_v10, %s2947_s24 }
 0x127   : > { %v3169_v20 = vpop.permute.xlu2 %596 }
 0x12f   : > { %v3189_v40 = vpop.permute.xlu2 %600 }
 0x137   : > { %v3163_v14 = vpop.permute.xlu1 %598  ;;  %v591_v15 = vpop.permute.xlu0 %590 }
 0x138   : > { %843 = vrot.lane.b32.xlu0 %v3163_v14, %s2947_s24  ;;  %835 = vrot.lane.b32.xlu1 %v591_v15, %s2947_s24  ;;  %v604_v18 = vpack.i.b16 %v591_v15, %v3151_v10  ;;  %v606_v19 = vshrl.u32 %v591_v15, 16  ;;  %v612_v28 = vshrl.u32 %v3163_v14, 16 }
 0x13a   : > { %v630_v25 = vperm.slane %v604_v18, %v3171_v21  ;;  %v607_v26 = vpack.i.b16 %v606_v19, %v605_v22 }
 0x13c   : > { %v639_v32 = vrot.slane %v630_v25, 4  ;;  %v657_v35 = vperm.slane %v607_v26, %v3171_v21  ;;  %v617_v26 = vshrl.u32 %v3155_v13, 16 }
 0x13e   : > { %v665_v42 = vrot.slane %v657_v35, 4 }
 0x13f   : > { %v593_v43 = vpop.permute.xlu1 %592 }
 0x140   : > { %v595_v27 = vpop.permute.xlu0 %594  ;;  %841 = vrot.lane.b32.xlu0 %v3169_v20, %s2947_s24  ;;  %833 = vrot.lane.b32.xlu1 %v3155_v13, %s2947_s24 }
 0x141   : > { %v610_v29 = vpack.i.b16 %v3163_v14, %v595_v27  ;;  %v611_v30 = vshrl.u32 %v595_v27, 16  ;;  %839 = vrot.lane.b32.xlu2 %v595_v27, %s2947_s24 }
 0x143   : > { %v613_v33 = vpack.i.b16 %v612_v28, %v611_v30  ;;  %v635_v34 = vperm.slane %v610_v29, %v3171_v21  ;;  %v624_v29 = vshrl.u32 %v3189_v40, 16  ;;  %v623_v30 = vshrl.u32 %v3169_v20, 16 }
 0x145   : > { %v636_v36 = vrot.slane %v635_v34, 4  ;;  %v640_v37 = vsel %vm637_vm2, %v635_v34, %v639_v32  ;;  %v662_v38 = vperm.slane %v613_v33, %v3171_v21  ;;  %v622_v34 = vpack.i.b16 %v3189_v40, %v3169_v20 }
 0x146   : > { %v648_v39 = vperm.slane %v640_v37, %v3182_v31 }
 0x147   : > { %v638_v41 = vsel %vm637_vm2, %v636_v36, %v630_v25  ;;  %v663_v46 = vrot.slane %v662_v38, 4  ;;  %v666_v50 = vsel %vm637_vm2, %v662_v38, %v665_v42  ;;  %v618_v25 = vshrl.u32 %v593_v43, 16 }
 0x148   : > { %v644_v44 = vperm.slane %v638_v41, %v3182_v31  ;;  %v651_v45 = vrot.slane %v648_v39, 4  ;;  %1079 = vrot.lane.b32.xlu0 %v591_v15, %s2950_s29  ;;  %845 = vrot.lane.b32.xlu1 %v3189_v40, %s2947_s24  ;;  %v674_v52 = vperm.slane %v666_v50, %v3182_v31  ;;  %v688_v38 = vperm.slane %v622_v34, %v3171_v21 }
 0x149   : > { %837 = vrot.lane.b32.xlu2 %v593_v43, %s2947_s24  ;;  %v664_v49 = vsel %vm637_vm2, %v663_v46, %v657_v35  ;;  %v619_v28 = vpack.i.b16 %v618_v25, %v617_v26  ;;  %v625_v35 = vpack.i.b16 %v624_v29, %v623_v30 }
 0x14a   : > { %v649_v47 = vrot.slane %v644_v44, 4  ;;  %v652_v48 = vsel %vm637_vm2, 0, %v651_v45  ;;  %v670_v51 = vperm.slane %v664_v49, %v3182_v31  ;;  %v731_v55 = vsel %vm637_vm2, %v651_v45, %v644_v44 }
 0x14b   : > { %v736_v53 = vrot.slane %v652_v48, 4  ;;  %v677_v57 = vrot.slane %v674_v52, 4  ;;  %v735_v0 = vperm.slane %v731_v55, %v3171_v21  ;;  %v709_v33 = vperm.slane %v619_v28, %v3171_v21 }
 0x14c   : > { %v650_v54 = vsel %vm637_vm2, 0, %v649_v47  ;;  %v675_v56 = vrot.slane %v670_v51, 4  ;;  %v714_v39 = vperm.slane %v625_v35, %v3171_v21  ;;  %v689_v44 = vrot.slane %v688_v38, 4 }
 0x14d   : > { %v737_v58 = vsel %vm637_vm2, %v736_v53, %v650_v54  ;;  %v678_v59 = vsel %vm637_vm2, 0, %v677_v57  ;;  %v750_v62 = vsel %vm637_vm2, %v677_v57, %v670_v51  ;;  %v717_v37 = vrot.slane %v709_v33, 4 }
 0x14e   : > { %v676_v60 = vsel %vm637_vm2, 0, %v675_v56  ;;  %v741_v61 = vperm.slane %v737_v58, %v3171_v21  ;;  %v755_v63 = vrot.slane %v678_v59, 4  ;;  %v754_v6 = vperm.slane %v750_v62, %v3171_v21  ;;  %v832_v59 = vpop.permute.xlu0 %831 }
 0x14f   : > { %v718_v41 = vsel %vm637_vm2, %v714_v39, %v717_v37  ;;  %v715_v45 = vrot.slane %v714_v39, 4 }
 0x150   : > { %1077 = vrot.lane.b32.xlu0 %v3155_v13, %s2950_s29  ;;  %1083 = vrot.lane.b32.xlu1 %v595_v27, %s2950_s29  ;;  %v742_v1 = vrot.slane %v741_v61, 4  ;;  %v756_v2 = vsel %vm637_vm2, %v755_v63, %v676_v60  ;;  %v616_v27 = vpack.i.b16 %v593_v43, %v3155_v13 }
 0x151   : > { %1075 = vrot.lane.b32.xlu2 %v3151_v10, %s2950_s29  ;;  %v760_v4 = vperm.slane %v756_v2, %v3171_v21  ;;  %v850_v2 = vshrl.u32 %v832_v59, 16 }
 0x152   : > { %v743_v3 = vsel %vm637_vm2, %v742_v1, %v735_v0  ;;  %v683_v32 = vperm.slane %v616_v27, %v3171_v21 }
 0x153   : > { %v3219_v5 = vperm.slane %v743_v3, %v3182_v31  ;;  %v761_v7 = vrot.slane %v760_v4, 4 }
 0x154   : > { %v691_v36 = vrot.slane %v683_v32, 4  ;;  %v690_v46 = vsel %vm637_vm2, %v689_v44, %v683_v32 }
 0x155   : > { %v748_v8 = vrot.slane %v3219_v5, 4  ;;  %v762_v9 = vsel %vm637_vm2, %v761_v7, %v754_v6  ;;  %v810_v11 = vshrl.u32 %v3219_v5, 16  ;;  %v696_v48 = vperm.slane %v690_v46, %v3182_v31 }
 0x156   : > { %v3230_v10 = vperm.slane %v762_v9, %v3182_v31  ;;  %v692_v13 = vsel %vm637_vm2, %v688_v38, %v691_v36 }
 0x157   : > { %v3237_v16 = vsel %vm637_vm2, 0, %v748_v8  ;;  %v700_v42 = vperm.slane %v692_v13, %v3182_v31  ;;  %v701_v52 = vrot.slane %v696_v48, 4 }
 0x158   : > { %1085 = vrot.lane.b32.xlu0 %v3169_v20, %s2950_s29  ;;  %1081 = vrot.lane.b32.xlu1 %v593_v43, %s2950_s29  ;;  %v809_v12 = vpack.i.b16 %v3230_v10, %v3219_v5  ;;  %v811_v15 = vshrl.u32 %v3230_v10, 16  ;;  %v767_v17 = vrot.slane %v3230_v10, 4  ;;  %v816_v22 = vshrl.u32 %v3237_v16, 16 }
 0x159   : > { %1087 = vrot.lane.b32.xlu2 %v3163_v14, %s2950_s29  ;;  %v726_v43 = vperm.slane %v718_v41, %v3182_v31  ;;  %v716_v20 = vsel %vm637_vm2, %v715_v45, %v709_v33  ;;  %v702_v57 = vsel %vm637_vm2, 0, %v701_v52 }
 0x15a   : > { %v3240_v18 = vpack.i.b16 %v811_v15, %v810_v11  ;;  %v3243_v19 = vsel %vm637_vm2, 0, %v767_v17  ;;  %v722_v49 = vperm.slane %v716_v20, %v3182_v31 }
 0x15b   : > { %v815_v14 = vpack.i.b16 %v3243_v19, %v3237_v16  ;;  %v817_v23 = vshrl.u32 %v3243_v19, 16  ;;  %v729_v47 = vrot.slane %v726_v43, 4 }
 0x15c   : > { %v727_v53 = vrot.slane %v722_v49, 4 }
 0x15d   : > { %v3251_v24 = vpack.i.b16 %v817_v23, %v816_v22  ;;  %v730_v51 = vsel %vm637_vm2, 0, %v729_v47  ;;  %v788_v1 = vsel %vm637_vm2, %v729_v47, %v722_v49 }
 0x15e   : > { %v793_v55 = vrot.slane %v730_v51, 4  ;;  %v728_v58 = vsel %vm637_vm2, 0, %v727_v53  ;;  %v792_v25 = vperm.slane %v788_v1, %v3171_v21 }
 0x160   : > { %1089 = vrot.lane.b32.xlu1 %v3189_v40, %s2950_s29  ;;  %v703_v40 = vrot.slane %v700_v42, 4  ;;  %v794_v61 = vsel %vm637_vm2, %v793_v55, %v728_v58 }
 0x161   : > { %v798_v63 = vperm.slane %v794_v61, %v3171_v21 }
 0x162   : > { %v704_v50 = vsel %vm637_vm2, 0, %v703_v40  ;;  %v769_v0 = vsel %vm637_vm2, %v703_v40, %v696_v48 }
 0x163   : > { %v774_v54 = vrot.slane %v704_v50, 4  ;;  %v799_v8 = vrot.slane %v798_v63, 4  ;;  %v773_v23 = vperm.slane %v769_v0, %v3171_v21 }
 0x165   : > { %v775_v60 = vsel %vm637_vm2, %v774_v54, %v702_v57  ;;  %v800_v32 = vsel %vm637_vm2, %v799_v8, %v792_v25 }
 0x166   : > { %v779_v62 = vperm.slane %v775_v60, %v3171_v21  ;;  %v3297_v46 = vperm.slane %v800_v32, %v3182_v31 }
 0x168   : > { %v780_v7 = vrot.slane %v779_v62, 4  ;;  %v823_v1 = vshrl.u32 %v3297_v46, 16 }
 0x16a   : > { %v781_v30 = vsel %vm637_vm2, %v780_v7, %v773_v23 }
 0x16b   : > { %v3294_v45 = vperm.slane %v781_v30, %v3182_v31 }
 0x16d   : > { %v822_v58 = vshrl.u32 %v3294_v45, 16  ;;  %v821_v61 = vpack.i.b16 %v3297_v46, %v3294_v45  ;;  %v786_v62 = vrot.slane %v3294_v45, 4 }
 0x16f   : > { %v3320_v32 = vsel %vm637_vm2, 0, %v786_v62 }
 0x19b   : > { %v840_v56 = vpop.permute.xlu2 %839 }
 0x19c   : > { %v856_v3 = vshrl.u32 %v840_v56, 16 }
 0x1a3   : > { %v838_v9 = vpop.permute.xlu2 %837 }
 0x1a4   : > { %v863_v20 = vshrl.u32 %v838_v9, 16 }
 0x1aa   : > { %v836_v4 = vpop.permute.xlu1 %835  ;;  %v844_v6 = vpop.permute.xlu0 %843 }
 0x1ab   : > { %v849_v11 = vpack.i.b16 %v836_v4, %v832_v59  ;;  %v851_v15 = vshrl.u32 %v836_v4, 16  ;;  %v855_v17 = vpack.i.b16 %v844_v6, %v840_v56  ;;  %v857_v22 = vshrl.u32 %v844_v6, 16  ;;  %v1076_v53 = vpop.permute.xlu2 %1075 }
 0x1ad   : > { %v852_v26 = vpack.i.b16 %v851_v15, %v850_v2  ;;  %v875_v27 = vperm.slane %v849_v11, %v3171_v21  ;;  %v858_v28 = vpack.i.b16 %v857_v22, %v856_v3  ;;  %v880_v29 = vperm.slane %v855_v17, %v3171_v21 }
 0x1ae   : > { %v805_v2 = vrot.slane %v3297_v46, 4  ;;  %v1094_v3 = vshrl.u32 %v1076_v53, 16 }
 0x1af   : > { %v883_v33 = vrot.slane %v875_v27, 4  ;;  %v901_v34 = vperm.slane %v852_v26, %v3171_v21  ;;  %v881_v35 = vrot.slane %v880_v29, 4  ;;  %v906_v36 = vperm.slane %v858_v28, %v3171_v21 }
 0x1b1   : > { %v909_v37 = vrot.slane %v901_v34, 4  ;;  %v882_v38 = vsel %vm637_vm2, %v881_v35, %v875_v27  ;;  %v884_v39 = vsel %vm637_vm2, %v880_v29, %v883_v33  ;;  %v907_v13 = vrot.slane %v906_v36, 4 }
 0x1b2   : > { %v888_v41 = vperm.slane %v882_v38, %v3182_v31  ;;  %v892_v42 = vperm.slane %v884_v39, %v3182_v31  ;;  %v834_v43 = vpop.permute.xlu1 %833  ;;  %v842_v44 = vpop.permute.xlu0 %841 }
 0x1b3   : > { %v908_v40 = vsel %vm637_vm2, %v907_v13, %v901_v34  ;;  %v910_v47 = vsel %vm637_vm2, %v906_v36, %v909_v37  ;;  %v862_v48 = vshrl.u32 %v834_v43, 16  ;;  %v861_v54 = vpack.i.b16 %v838_v9, %v834_v43 }
 0x1b4   : > { %v893_v49 = vrot.slane %v888_v41, 4  ;;  %v895_v50 = vrot.slane %v892_v42, 4  ;;  %v914_v51 = vperm.slane %v908_v40, %v3182_v31  ;;  %v918_v52 = vperm.slane %v910_v47, %v3182_v31  ;;  %v1088_v42 = vpop.permute.xlu2 %1087 }
 0x1b5   : > { %v864_v57 = vpack.i.b16 %v863_v20, %v862_v48  ;;  %v927_v6 = vperm.slane %v861_v54, %v3171_v21  ;;  %v868_v9 = vshrl.u32 %v842_v44, 16  ;;  %v3327_v13 = vsel %vm637_vm2, 0, %v805_v2 }
 0x1b6   : > { %v896_v55 = vsel %vm637_vm2, 0, %v895_v50  ;;  %v921_v56 = vrot.slane %v918_v52, 4  ;;  %v919_v59 = vrot.slane %v914_v51, 4  ;;  %v894_v63 = vsel %vm637_vm2, 0, %v893_v49 }
 0x1b7   : > { %v980_v60 = vrot.slane %v896_v55, 4  ;;  %v953_v8 = vperm.slane %v864_v57, %v3171_v21  ;;  %v975_v17 = vsel %vm637_vm2, %v895_v50, %v888_v41  ;;  %v935_v33 = vrot.slane %v927_v6, 4 }
 0x1b8   : > { %v922_v0 = vsel %vm637_vm2, 0, %v921_v56  ;;  %v920_v27 = vsel %vm637_vm2, 0, %v919_v59  ;;  %v979_v37 = vperm.slane %v975_v17, %v3171_v21  ;;  %v994_v38 = vsel %vm637_vm2, %v921_v56, %v914_v51 }
 0x1b9   : > { %v999_v4 = vrot.slane %v922_v0, 4  ;;  %v981_v7 = vsel %vm637_vm2, %v980_v60, %v894_v63  ;;  %v961_v41 = vrot.slane %v953_v8, 4  ;;  %v1101_v54 = vshrl.u32 %v1088_v42, 16 }
 0x1ba   : > { %v846_v11 = vpop.permute.xlu1 %845  ;;  %v1080_v15 = vpop.permute.xlu0 %1079  ;;  %v985_v22 = vperm.slane %v981_v7, %v3171_v21  ;;  %v998_v60 = vperm.slane %v994_v38, %v3171_v21 }
 0x1bb   : > { %v867_v23 = vpack.i.b16 %v846_v11, %v842_v44  ;;  %v869_v25 = vshrl.u32 %v846_v11, 16  ;;  %v1095_v26 = vshrl.u32 %v1080_v15, 16  ;;  %v1093_v28 = vpack.i.b16 %v1080_v15, %v1076_v53 }
 0x1bc   : > { %v986_v29 = vrot.slane %v985_v22, 4  ;;  %v1000_v30 = vsel %vm637_vm2, %v999_v4, %v920_v27 }
 0x1bd   : > { %v870_v34 = vpack.i.b16 %v869_v25, %v868_v9  ;;  %v932_v35 = vperm.slane %v867_v23, %v3171_v21  ;;  %v1096_v36 = vpack.i.b16 %v1095_v26, %v1094_v3  ;;  %v1004_v39 = vperm.slane %v1000_v30, %v3171_v21 }
 0x1be   : > { %v1119_v47 = vperm.slane %v1093_v28, %v3171_v21  ;;  %v987_v49 = vsel %vm637_vm2, %v986_v29, %v979_v37 }
 0x1bf   : > { %v933_v43 = vrot.slane %v932_v35, 4  ;;  %v936_v44 = vsel %vm637_vm2, %v932_v35, %v935_v33  ;;  %v958_v20 = vperm.slane %v870_v34, %v3171_v21  ;;  %v1145_v48 = vperm.slane %v1096_v36, %v3171_v21 }
 0x1c0   : > { %v944_v40 = vperm.slane %v936_v44, %v3182_v31  ;;  %v1005_v53 = vrot.slane %v1004_v39, 4  ;;  %v1127_v3 = vrot.slane %v1119_v47, 4 }
 0x1c1   : > { %v934_v50 = vsel %vm637_vm2, %v933_v43, %v927_v6  ;;  %v959_v51 = vrot.slane %v958_v20, 4  ;;  %v962_v52 = vsel %vm637_vm2, %v958_v20, %v961_v41  ;;  %v1153_v4 = vrot.slane %v1145_v48, 4 }
 0x1c2   : > { %v3338_v55 = vperm.slane %v934_v50, %v3182_v31  ;;  %v3340_v56 = vrot.slane %v944_v40, 4  ;;  %v1084_v57 = vpop.permute.xlu1 %1083  ;;  %v3342_v59 = vpop.permute.xlu0 %1077  ;;  %v970_v63 = vperm.slane %v962_v52, %v3182_v31  ;;  %v991_v6 = vperm.slane %v987_v49, %v3182_v31 }
 0x1c3   : > { %v960_v62 = vsel %vm637_vm2, %v959_v51, %v953_v8  ;;  %v1099_v0 = vpack.i.b16 %v1088_v42, %v1084_v57  ;;  %v1100_v2 = vshrl.u32 %v1084_v57, 16  ;;  %v1106_v11 = vshrl.u32 %v3342_v59, 16 }
 0x1c4   : > { %v1006_v15 = vsel %vm637_vm2, %v1005_v53, %v998_v60  ;;  %v945_v17 = vrot.slane %v3338_v55, 4  ;;  %v3354_v8 = vsel %vm637_vm2, 0, %v3340_v56  ;;  %v3357_v22 = vperm.slane %v960_v62, %v3182_v31 }
 0x1c5   : > { %v1102_v7 = vpack.i.b16 %v1101_v54, %v1100_v2  ;;  %v1124_v9 = vperm.slane %v1099_v0, %v3171_v21  ;;  %v1010_v23 = vperm.slane %v1006_v15, %v3182_v31  ;;  %v3360_v25 = vrot.slane %v970_v63, 4 }
 0x1c6   : > { %v1054_v33 = vshrl.u32 %v991_v6, 16  ;;  %v992_v38 = vrot.slane %v991_v6, 4  ;;  %v971_v63 = vrot.slane %v3357_v22, 4 }
 0x1c7   : > { %v1125_v26 = vrot.slane %v1124_v9, 4  ;;  %v1128_v27 = vsel %vm637_vm2, %v1124_v9, %v1127_v3  ;;  %v1150_v28 = vperm.slane %v1102_v7, %v3171_v21  ;;  %v1053_v30 = vpack.i.b16 %v1010_v23, %v991_v6 }
 0x1c8   : > { %v1136_v29 = vperm.slane %v1128_v27, %v3182_v31  ;;  %v1055_v34 = vshrl.u32 %v1010_v23, 16  ;;  %v974_v20 = vsel %vm637_vm2, 0, %v3360_v25  ;;  %v993_v60 = vsel %vm637_vm2, 0, %v992_v38 }
 0x1c9   : > { %v1126_v35 = vsel %vm637_vm2, %v1125_v26, %v1119_v47  ;;  %v1151_v36 = vrot.slane %v1150_v28, 4  ;;  %v1154_v37 = vsel %vm637_vm2, %v1150_v28, %v1153_v4  ;;  %v1324_v43 = vsel %vm1319_vm3, %v1053_v30, 0 }
 0x1ca   : > { %v1132_v39 = vperm.slane %v1126_v35, %v3182_v31  ;;  %v1139_v41 = vrot.slane %v1136_v29, 4  ;;  %v1162_v42 = vperm.slane %v1154_v37, %v3182_v31  ;;  %v1082_v44 = vpop.permute.xlu1 %1081  ;;  %1333 = vmatpush.bf16.xpose.msra.mxu1 %v1324_v43  ;;  %v1056_v49 = vpack.i.b16 %v1055_v34, %v1054_v33  ;;  %v1086_v9 = vpop.permute.xlu0 %1085 }
 0x1cb   : > { %v1152_v40 = vsel %vm637_vm2, %v1151_v36, %v1145_v48  ;;  %v1011_v47 = vrot.slane %v1010_v23, 4  ;;  %v1018_v48 = vrot.slane %v3354_v8, 4  ;;  %v946_v3 = vsel %vm637_vm2, 0, %v945_v17 }
 0x1cc   : > { %v1137_v50 = vrot.slane %v1132_v39, 4  ;;  %v1140_v51 = vsel %vm637_vm2, 0, %v1139_v41  ;;  %v3375_v52 = vperm.slane %v1152_v40, %v3182_v31  ;;  %v1165_v53 = vrot.slane %v1162_v42, 4 }
 0x1cd   : > { %v1224_v54 = vrot.slane %v1140_v51, 4  ;;  %v1343_v57 = vsel %vm1319_vm3, %v1056_v49, 0  ;;  %v1012_v62 = vsel %vm637_vm2, 0, %v1011_v47  ;;  %v3384_v2 = vsel %vm637_vm2, %v1139_v41, %v1132_v39 }
 0x1ce   : > { %v1138_v0 = vsel %vm637_vm2, 0, %v1137_v50  ;;  %1352 = vmatpush.bf16.xpose.msra.mxu2 %v1343_v57  ;;  %v1037_v4 = vrot.slane %v974_v20, 4  ;;  %v1163_v6 = vrot.slane %v3375_v52, 4  ;;  %v1059_v7 = vpack.i.b16 %v1012_v62, %v993_v60 }
 0x1cf   : > { %v3389_v15 = vsel %vm637_vm2, 0, %v1165_v53  ;;  %v1060_v23 = vshrl.u32 %v993_v60, 16  ;;  %v1061_v26 = vshrl.u32 %v1012_v62, 16  ;;  %v1105_v8 = vpack.i.b16 %v1082_v44, %v3342_v59 }
 0x1d0   : > { %v1223_v27 = vperm.slane %v3384_v2, %v3171_v21  ;;  %v1225_v28 = vsel %vm637_vm2, %v1224_v54, %v1138_v0  ;;  %v1362_v29 = vsel %vm1319_vm3, %v1059_v7, 0  ;;  %v1107_v17 = vshrl.u32 %v1082_v44, 16 }
 0x1d1   : > { %1371 = vmatpush.bf16.xpose.msra.mxu3 %v1362_v29  ;;  %v1171_v30 = vperm.slane %v1105_v8, %v3171_v21  ;;  %v1112_v33 = vshrl.u32 %v1086_v9, 16  ;;  %v1062_v34 = vpack.i.b16 %v1061_v26, %v1060_v23  ;;  %2518 = vmatmul.msk.bf16.vlgmr.msra.gmra.mxu1 %vm1319_vm3, %v809_v12  ;;  %v972_v59 = vsel %vm637_vm2, 0, %v971_v63 }
 0x1d2   : > { %v1090_v35 = vpop.permute.xlu1 %1089  ;;  %v1108_v36 = vpack.i.b16 %v1107_v17, %v1106_v11  ;;  %v1013_v39 = vsel %vm637_vm2, %v3340_v56, %v3338_v55  ;;  %v3407_v41 = vsel %vm637_vm2, %v1165_v53, %v3375_v52  ;;  %v1243_v42 = vrot.slane %v3389_v15, 4 }
 0x1d3   : > { %v1111_v37 = vpack.i.b16 %v1090_v35, %v1086_v9  ;;  %v1113_v38 = vshrl.u32 %v1090_v35, 16  ;;  %v1381_v5 = vsel %vm1319_vm3, %v1062_v34, 0  ;;  %v1019_v10 = vsel %vm637_vm2, %v1018_v48, %v946_v3 }
 0x1d4   : > { %v1179_v12 = vrot.slane %v1171_v30, 4  ;;  %v1197_v43 = vperm.slane %v1108_v36, %v3171_v21  ;;  %1390 = vmatpush.bf16.xpose.msrb.mxu0 %v1381_v5  ;;  %v1017_v56 = vperm.slane %v1013_v39, %v3171_v21  ;;  %v1023_v44 = vperm.slane %v1019_v10, %v3171_v21 }
 0x1d5   : > { %2519 = vmatmul.msk.bf16.vlgmr.msra.gmra.mxu2 %vm1319_vm3, %v3240_v18  ;;  %v1114_v11 = vpack.i.b16 %v1113_v38, %v1112_v33  ;;  %v1176_v55 = vperm.slane %v1111_v37, %v3171_v21  ;;  %v1038_v20 = vsel %vm637_vm2, %v1037_v4, %v972_v59  ;;  %v1229_v40 = vperm.slane %v1225_v28, %v3171_v21 }
 0x1d6   : > { %v1205_v49 = vrot.slane %v1197_v43, 4  ;;  %v1024_v18 = vrot.slane %v1023_v44, 4  ;;  %v1032_v53 = vsel %vm637_vm2, %v3360_v25, %v3357_v22  ;;  %v1042_v54 = vperm.slane %v1038_v20, %v3171_v21 }
 0x1d7   : > { %v1177_v47 = vrot.slane %v1176_v55, 4  ;;  %v1180_v50 = vsel %vm637_vm2, %v1176_v55, %v1179_v12  ;;  %v1202_v51 = vperm.slane %v1114_v11, %v3171_v21  ;;  %v1230_v63 = vrot.slane %v1229_v40, 4 }
 0x1d8   : > { %v1188_v52 = vperm.slane %v1180_v50, %v3182_v31  ;;  %2520 = vmatmul.msk.bf16.vlgmr.msra.gmra.mxu3 %vm1319_vm3, %v815_v14  ;;  %v1025_v22 = vsel %vm637_vm2, %v1024_v18, %v1017_v56  ;;  %v1036_v16 = vperm.slane %v1032_v53, %v3171_v21  ;;  %v1043_v19 = vrot.slane %v1042_v54, 4 }
 0x1d9   : > { %v1178_v57 = vsel %vm637_vm2, %v1177_v47, %v1171_v30  ;;  %v1203_v60 = vrot.slane %v1202_v51, 4  ;;  %v1206_v62 = vsel %vm637_vm2, %v1202_v51, %v1205_v49  ;;  %v1029_v3 = vperm.slane %v1025_v22, %v3182_v31 }
 0x1da   : > { %v1184_v48 = vperm.slane %v1178_v57, %v3182_v31  ;;  %v1191_v0 = vrot.slane %v1188_v52, 4  ;;  %v1214_v2 = vperm.slane %v1206_v62, %v3182_v31  ;;  %v1164_v15 = vsel %vm637_vm2, 0, %v1163_v6 }
 0x1db   : > { %v1204_v25 = vsel %vm637_vm2, %v1203_v60, %v1197_v43  ;;  %2521 = vmatmul.msk.bf16.vlgmr.msrb.gmra.mxu0 %vm1319_vm3, %v3251_v24  ;;  %v1044_v26 = vsel %vm637_vm2, %v1043_v19, %v1036_v16  ;;  %v1231_v8 = vsel %vm637_vm2, %v1230_v63, %v1223_v27  ;;  %v1242_v17 = vperm.slane %v3407_v41, %v3171_v21 }
 0x1dc   : > { %v1189_v14 = vrot.slane %v1184_v48, 4  ;;  %v1192_v4 = vsel %vm637_vm2, 0, %v1191_v0  ;;  %v1210_v7 = vperm.slane %v1204_v25, %v3182_v31  ;;  %v1217_v9 = vrot.slane %v1214_v2, 4 }
 0x1dd   : > { %v1262_v23 = vrot.slane %v1192_v4, 4  ;;  %v829_v30 = vshrl.u32 %v3327_v13, 16  ;;  %v1257_v34 = vsel %vm637_vm2, %v1191_v0, %v1184_v48  ;;  %v1048_v6 = vperm.slane %v1044_v26, %v3182_v31 }
 0x1de   : > { %v1190_v28 = vsel %vm637_vm2, 0, %v1189_v14  ;;  %v1215_v29 = vrot.slane %v1210_v7, 4  ;;  %v1218_v33 = vsel %vm637_vm2, 0, %v1217_v9  ;;  %v1066_v35 = vshrl.u32 %v1029_v3, 16 }
 0x1df   : > { %v1263_v24 = vsel %vm637_vm2, %v1262_v23, %v1190_v28  ;;  %v1030_v59 = vrot.slane %v1029_v3, 4  ;;  %v1235_v27 = vperm.slane %v1231_v8, %v3182_v31  ;;  %v1244_v36 = vsel %vm637_vm2, %v1243_v42, %v1164_v15 }
 0x1e0   : > { %v1065_v37 = vpack.i.b16 %v1048_v6, %v1029_v3  ;;  %v1067_v38 = vshrl.u32 %v1048_v6, 16  ;;  %v1049_v39 = vrot.slane %v1048_v6, 4  ;;  %v1248_v41 = vperm.slane %v1244_v36, %v3171_v21 }
 0x1e1   : > { %v1216_v5 = vsel %vm637_vm2, 0, %v1215_v29  ;;  %v1281_v10 = vrot.slane %v1218_v33, 4  ;;  %v1031_v12 = vsel %vm637_vm2, 0, %v1030_v59  ;;  %v1267_v43 = vperm.slane %v1263_v24, %v3171_v21 }
 0x1e2   : > { %v1400_v11 = vsel %vm1319_vm3, %v1065_v37, 0  ;;  %v1068_v55 = vpack.i.b16 %v1067_v38, %v1066_v35  ;;  %v1050_v56 = vsel %vm637_vm2, 0, %v1049_v39  ;;  %v1236_v44 = vrot.slane %v1235_v27, 4 }
 0x1e3   : > { %1409 = vmatpush.bf16.xpose.msrb.mxu1 %v1400_v11  ;;  %v1071_v42 = vpack.i.b16 %v1050_v56, %v1031_v12  ;;  %v1072_v20 = vshrl.u32 %v1031_v12, 16  ;;  %v1073_v40 = vshrl.u32 %v1050_v56, 16  ;;  %v1249_v49 = vrot.slane %v1248_v41, 4 }
 0x1e4   : > { %v1261_v47 = vperm.slane %v1257_v34, %v3171_v21  ;;  %v1276_v50 = vsel %vm637_vm2, %v1217_v9, %v1210_v7  ;;  %v1419_v51 = vsel %vm1319_vm3, %v1068_v55, 0  ;;  %v1268_v52 = vrot.slane %v1267_v43, 4 }
 0x1e5   : > { %1428 = vmatpush.bf16.xpose.msrb.mxu2 %v1419_v51  ;;  %v1438_v18 = vsel %vm1319_vm3, %v1071_v42, 0  ;;  %v1074_v53 = vpack.i.b16 %v1073_v40, %v1072_v20  ;;  %v1250_v54 = vsel %vm637_vm2, %v1249_v49, %v1242_v17  ;;  %v1282_v57 = vsel %vm637_vm2, %v1281_v10, %v1216_v5 }
 0x1e6   : > { %1447 = vmatpush.bf16.xpose.msrb.mxu3 %v1438_v18  ;;  %v1254_v60 = vperm.slane %v1250_v54, %v3182_v31  ;;  %v1298_v62 = vshrl.u32 %v1235_v27, 16  ;;  %v1269_v63 = vsel %vm637_vm2, %v1268_v52, %v1261_v47  ;;  %v1286_v48 = vperm.slane %v1282_v57, %v3171_v21 }
 0x1e7   : > { %v1457_v0 = vsel %vm1319_vm3, %v1074_v53, 0  ;;  %v1237_v2 = vsel %vm637_vm2, 0, %v1236_v44  ;;  %v1273_v22 = vperm.slane %v1269_v63, %v3182_v31  ;;  %v1280_v25 = vperm.slane %v1276_v50, %v3171_v21 }
 0x1e8   : > { %1466 = vmatpush.bf16.xpose.msra.mxu0 %v1457_v0  ;;  %v1297_v3 = vpack.i.b16 %v1254_v60, %v1235_v27  ;;  %v1299_v16 = vshrl.u32 %v1254_v60, 16  ;;  %v1255_v19 = vrot.slane %v1254_v60, 4  ;;  %v1287_v14 = vrot.slane %v1286_v48, 4 }
 0x1e9   : > { %v824_v4 = vpack.i.b16 %v823_v1, %v822_v58  ;;  %v827_v7 = vpack.i.b16 %v3327_v13, %v3320_v32  ;;  %v828_v9 = vshrl.u32 %v3320_v32, 16  ;;  %v1274_v15 = vrot.slane %v1273_v22, 4 }
 0x1ea   : > { %v1605_v23 = vsel %vm1603_vm4, %v1297_v3, 0  ;;  %2522 = vmatmul.msk.bf16.vlgmr.msrb.gmra.mxu1 %vm1319_vm3, %v821_v61  ;;  %v1300_v26 = vpack.i.b16 %v1299_v16, %v1298_v62  ;;  %v1256_v8 = vsel %vm637_vm2, 0, %v1255_v19  ;;  %v1288_v28 = vsel %vm637_vm2, %v1287_v14, %v1280_v25 }
 0x1eb   : > { %1614 = vmatpush.bf16.msra.mxu1 %v1605_v23  ;;  %v1303_v58 = vpack.i.b16 %v1256_v8, %v1237_v2  ;;  %v1304_v1 = vshrl.u32 %v1237_v2, 16  ;;  %v1305_v29 = vshrl.u32 %v1256_v8, 16  ;;  %v1292_v17 = vperm.slane %v1288_v28, %v3182_v31 }
 0x1ec   : > { %v1624_v32 = vsel %vm1603_vm4, %v1300_v26, 0  ;;  %2523 = vmatmul.msk.bf16.vlgmr.msrb.gmra.mxu2 %vm1319_vm3, %v824_v4  ;;  %v830_v45 = vpack.i.b16 %v829_v30, %v828_v9  ;;  %v1310_v46 = vshrl.u32 %v1273_v22, 16  ;;  %v1275_v6 = vsel %vm637_vm2, 0, %v1274_v15 }
 0x1ed   : > { %1633 = vmatpush.bf16.msra.mxu2 %v1624_v32  ;;  %v1643_v61 = vsel %vm1603_vm4, %v1303_v58, 0  ;;  %2524 = vmatmul.msk.bf16.vlgmr.msrb.gmra.mxu3 %vm1319_vm3, %v827_v7  ;;  %v1306_v33 = vpack.i.b16 %v1305_v29, %v1304_v1  ;;  %v1309_v34 = vpack.i.b16 %v1292_v17, %v1273_v22  ;;  %v1311_v24 = vshrl.u32 %v1292_v17, 16 }
 0x1ee   : > { %1652 = vmatpush.bf16.msra.mxu3 %v1643_v61  ;;  %v1293_v35 = vrot.slane %v1292_v17, 4  ;;  %v1316_v38 = vshrl.u32 %v1275_v6, 16 }
 0x1ef   : > { %v1662_v59 = vsel %vm1603_vm4, %v1306_v33, 0  ;;  %2525 = vmatmul.msk.bf16.vlgmr.msra.gmra.mxu0 %vm1319_vm3, %v830_v45  ;;  %v1681_v13 = vsel %vm1603_vm4, %v1309_v34, 0  ;;  %v1312_v30 = vpack.i.b16 %v1311_v24, %v1310_v46 }
 0x1f0   : > { %1671 = vmatpush.bf16.msrb.mxu0 %v1662_v59  ;;  %1690 = vmatpush.bf16.msrb.mxu1 %v1681_v13  ;;  %v1294_v27 = vsel %vm637_vm2, 0, %v1293_v35 }
 0x1f1   : > { %v1700_v36 = vsel %vm1603_vm4, %v1312_v30, 0  ;;  %v1315_v37 = vpack.i.b16 %v1294_v27, %v1275_v6  ;;  %v1317_v39 = vshrl.u32 %v1294_v27, 16 }
 0x1f2   : > { %1709 = vmatpush.bf16.msrb.mxu2 %v1700_v36 }
 0x1f3   : > { %v1719_v41 = vsel %vm1603_vm4, %v1315_v37, 0  ;;  %v1318_v5 = vpack.i.b16 %v1317_v39, %v1316_v38 }
 0x1f4   : > { %1728 = vmatpush.bf16.msrb.mxu3 %v1719_v41 }
 0x1f5   : > { %v1738_v10 = vsel %vm1603_vm4, %v1318_v5, 0 }
 0x1f6   : > { %1747 = vmatpush.bf16.msra.mxu0 %v1738_v10 }
 0x24e   : > { %v1335_v12 = vpop.f32.mrf.mxu1 }
 0x24f   : > { %v1472_v43 = vsel %vm1319_vm3, %v1335_v12, -inf }
 0x250   : > { %1473 = vmax.xlane.f32.xlu1 %v1472_v43 }
 0x256   : > { %v1337_v11 = vpop.f32.mrf.mxu1 }
 0x258   : > { %v1354_v55 = vpop.f32.mrf.mxu2  ;;  %v1392_v56 = vpop.f32.mrf.mxu0 }
 0x259   : > { %v1475_v44 = vsel %vm1319_vm3, %v1354_v55, -inf  ;;  %v1481_v50 = vsel %vm1319_vm3, %v1392_v56, -inf }
 0x25a   : > { %1476 = vmax.xlane.f32.xlu0 %v1475_v44 }
 0x25b   : > { %v1373_v42 = vpop.f32.mrf.mxu3 }
 0x25c   : > { %v1478_v20 = vsel %vm1319_vm3, %v1373_v42, -inf }
 0x25d   : > { %1479 = vmax.xlane.f32.xlu2 %v1478_v20 }
 0x260   : > { %v1356_v40 = vpop.f32.mrf.mxu2  ;;  %v1394_v49 = vpop.f32.mrf.mxu0 }
 0x263   : > { %v1375_v47 = vpop.f32.mrf.mxu3 }
 0x265   : > { %1482 = vmax.xlane.f32.xlu2 %v1481_v50 }
 0x267   : > { %v1411_v51 = vpop.f32.mrf.mxu1 }
 0x268   : > { %v1484_v52 = vsel %vm1319_vm3, %v1411_v51, -inf }
 0x269   : > { %1485 = vmax.xlane.f32.xlu0 %v1484_v52 }
 0x26c   : > { %v1468_v18 = vpop.f32.mrf.mxu0 }
 0x26d   : > { %v1493_v53 = vsel %vm1319_vm3, %v1468_v18, -inf }
 0x26e   : > { %1494 = vmax.xlane.f32.xlu1 %v1493_v53 }
 0x26f   : > { %v1413_v54 = vpop.f32.mrf.mxu1  ;;  %v3510_v57 = vpop.f32.mrf.mxu2 }
 0x270   : > { %v1449_v60 = vpop.f32.mrf.mxu3  ;;  %v1487_v2 = vsel %vm1319_vm3, %v3510_v57, -inf }
 0x271   : > { %v1490_v62 = vsel %vm1319_vm3, %v1449_v60, -inf }
 0x272   : > { %1491 = vmax.xlane.f32.xlu2 %v1490_v62 }
 0x274   : > { %v1470_v63 = vpop.f32.mrf.mxu0 }
 0x277   : > { %v1432_v48 = vpop.f32.mrf.mxu2 }
 0x278   : > { %v1451_v0 = vpop.f32.mrf.mxu3 }
 0x27a   : > { %1488 = vmax.xlane.f32.xlu2 %v1487_v2 }
 0x2c3   : > { %v3515_v22 = vpop.xlane.xlu1 %1473 }
 0x2c4   : > { %v1496_v25 = vmax.f32 %v3515_v22, -1e+30 }
 0x2c6   : > { %v1528_v3 = vsub.f32 %v1335_v12, %v1496_v25 }
 0x2c8   : > { %v1536_v16 = vmul.f32 1.442695, %v1528_v3 }
 0x2ca   : > { %2697 = vpow2.f32 %v1536_v16 }
 0x2cd   : > { %v3520_v19 = vpop.xlane.xlu0 %1476 }
 0x2ce   : > { %v1497_v14 = vmax.f32 %v3520_v19, -1e+30 }
 0x2d0   : > { %v1529_v4 = vsub.f32 %v1354_v55, %v1497_v14  ;;  %v3525_v7 = vpop.xlane.xlu2 %1479  ;;  %v2698_v9 = vpop.eup %2697  ;;  %v1505_v16 = vsub.f32 -1e+30, %v1497_v14 }
 0x2d1   : > { %v1498_v23 = vmax.f32 %v3525_v7, -1e+30  ;;  %v1592_v26 = vpack.c.bf16 %v2698_v9, %v2698_v9  ;;  %v1560_v8 = vsel %vm1319_vm3, %v2698_v9, 0.0 }
 0x2d2   : > { %v1538_v15 = vmul.f32 1.442695, %v1529_v4  ;;  %1561 = vadd.xlane.f32.xlu1 %v1560_v8 }
 0x2d3   : > { %v1530_v28 = vsub.f32 %v1373_v42, %v1498_v23  ;;  %2526 = vmatmul.msk.bf16.vlgmr.msra.gmra.mxu1 %vm1319_vm3, %v1592_v26  ;;  %v1506_v63 = vsub.f32 -1e+30, %v1498_v23 }
 0x2d4   : > { %2699 = vpow2.f32 %v1538_v15  ;;  %v1514_v15 = vmul.f32 1.442695, %v1505_v16 }
 0x2d5   : > { %v1540_v58 = vmul.f32 1.442695, %v1530_v28  ;;  %v1516_v2 = vmul.f32 1.442695, %v1506_v63 }
 0x2d7   : > { %2701 = vpow2.f32 %v1540_v58 }
 0x2d8   : > { %v3532_v1 = vpop.xlane.xlu2 %1482 }
 0x2d9   : > { %v1499_v29 = vmax.f32 %v3532_v1, -1e+30 }
 0x2da   : > { %v2700_v17 = vpop.eup %2699 }
 0x2db   : > { %v1593_v32 = vpack.c.bf16 %v2700_v17, %v2700_v17  ;;  %v1531_v45 = vsub.f32 %v1392_v56, %v1499_v29  ;;  %v1507_v0 = vsub.f32 -1e+30, %v1499_v29 }
 0x2dc   : > { %v3537_v46 = vpop.xlane.xlu0 %1485 }
 0x2dd   : > { %v1500_v61 = vmax.f32 %v3537_v46, -1e+30  ;;  %v1542_v33 = vmul.f32 1.442695, %v1531_v45  ;;  %2527 = vmatmul.msk.bf16.vlgmr.msra.gmra.mxu2 %vm1319_vm3, %v1593_v32  ;;  %v2702_v34 = vpop.eup %2701  ;;  %v1518_v3 = vmul.f32 1.442695, %v1507_v0 }
 0x2de   : > { %v1594_v24 = vpack.c.bf16 %v2702_v34, %v2702_v34  ;;  %v1566_v42 = vsel %vm1319_vm3, %v2702_v34, 0.0 }
 0x2df   : > { %v1532_v6 = vsub.f32 %v1411_v51, %v1500_v61  ;;  %2703 = vpow2.f32 %v1542_v33  ;;  %v1508_v22 = vsub.f32 -1e+30, %v1500_v61 }
 0x2e0   : > { %2528 = vmatmul.msk.bf16.vlgmr.msra.gmra.mxu3 %vm1319_vm3, %v1594_v24 }
 0x2e1   : > { %v1544_v35 = vmul.f32 1.442695, %v1532_v6  ;;  %v3543_v59 = vpop.xlane.xlu1 %1494  ;;  %v1520_v26 = vmul.f32 1.442695, %v1508_v22 }
 0x2e2   : > { %v1503_v13 = vmax.f32 %v3543_v59, -1e+30 }
 0x2e3   : > { %2705 = vpow2.f32 %v1544_v35 }
 0x2e4   : > { %v1535_v30 = vsub.f32 %v1468_v18, %v1503_v13  ;;  %v1563_v18 = vsel %vm1319_vm3, %v2700_v17, 0.0  ;;  %v1511_v1 = vsub.f32 -1e+30, %v1503_v13 }
 0x2e5   : > { %v1492_v27 = vpop.xlane.xlu2 %1491  ;;  %v2704_v36 = vpop.eup %2703 }
 0x2e6   : > { %v1550_v37 = vmul.f32 1.442695, %v1535_v30  ;;  %v1502_v38 = vmax.f32 %v1492_v27, -1e+30  ;;  %v1595_v39 = vpack.c.bf16 %v2704_v36, %v2704_v36  ;;  %v1569_v41 = vsel %vm1319_vm3, %v2704_v36, 0.0 }
 0x2e7   : > { %1570 = vadd.xlane.f32.xlu2 %v1569_v41  ;;  %v1526_v45 = vmul.f32 1.442695, %v1511_v1 }
 0x2e8   : > { %v1534_v5 = vsub.f32 %v1449_v60, %v1502_v38  ;;  %2707 = vpow2.f32 %v1550_v37  ;;  %2529 = vmatmul.msk.bf16.vlgmr.msrb.gmra.mxu0 %vm1319_vm3, %v1595_v39  ;;  %v1504_v60 = vsub.f32 -1e+30, %v1496_v25  ;;  %v1510_v8 = vsub.f32 -1e+30, %v1502_v38 }
 0x2e9   : > { %v2706_v10 = vpop.eup %2705 }
 0x2ea   : > { %v1548_v12 = vmul.f32 1.442695, %v1534_v5  ;;  %v1596_v43 = vpack.c.bf16 %v2706_v10, %v2706_v10  ;;  %v1572_v11 = vsel %vm1319_vm3, %v2706_v10, 0.0  ;;  %v1512_v62 = vmul.f32 1.442695, %v1504_v60 }
 0x2eb   : > { %1573 = vadd.xlane.f32.xlu0 %v1572_v11  ;;  %v1524_v17 = vmul.f32 1.442695, %v1510_v8 }
 0x2ec   : > { %2709 = vpow2.f32 %v1548_v12  ;;  %2530 = vmatmul.msk.bf16.vlgmr.msrb.gmra.mxu1 %vm1319_vm3, %v1596_v43 }
 0x2ed   : > { %v1489_v55 = vpop.xlane.xlu2 %1488 }
 0x2ee   : > { %v1501_v56 = vmax.f32 %v1489_v55, -1e+30  ;;  %v2708_v44 = vpop.eup %2707 }
 0x2ef   : > { %v1581_v40 = vsel %vm1319_vm3, %v2708_v44, 0.0  ;;  %1567 = vadd.xlane.f32.xlu2 %v1566_v42  ;;  %v1599_v52 = vpack.c.bf16 %v2708_v44, %v2708_v44 }
 0x2f0   : > { %v1533_v20 = vsub.f32 %v3510_v57, %v1501_v56  ;;  %1582 = vadd.xlane.f32.xlu1 %v1581_v40  ;;  %v1509_v46 = vsub.f32 -1e+30, %v1501_v56 }
 0x2f2   : > { %v1546_v49 = vmul.f32 1.442695, %v1533_v20  ;;  %v2710_v47 = vpop.eup %2709  ;;  %v1522_v27 = vmul.f32 1.442695, %v1509_v46 }
 0x2f3   : > { %v1598_v50 = vpack.c.bf16 %v2710_v47, %v2710_v47  ;;  %v1578_v51 = vsel %vm1319_vm3, %v2710_v47, 0.0 }
 0x2f4   : > { %2711 = vpow2.f32 %v1546_v49  ;;  %1579 = vadd.xlane.f32.xlu0 %v1578_v51 }
 0x2f5   : > { %2532 = vmatmul.msk.bf16.vlgmr.msrb.gmra.mxu3 %vm1319_vm3, %v1598_v50  ;;  %2713 = vpow2.f32 %v1512_v62 }
 0x2f6   : > { %2715 = vpow2.f32 %v1516_v2 }
 0x2f7   : > { %1564 = vadd.xlane.f32.xlu2 %v1563_v18  ;;  %2717 = vpow2.f32 %v1518_v3 }
 0x2f8   : > { %2533 = vmatmul.msk.bf16.vlgmr.msra.gmra.mxu0 %vm1319_vm3, %v1599_v52  ;;  %2719 = vpow2.f32 %v1514_v15 }
 0x2f9   : > { %2721 = vpow2.f32 %v1520_v26 }
 0x2fa   : > { %v2712_v53 = vpop.eup %2711 }
 0x2fb   : > { %v1597_v54 = vpack.c.bf16 %v2712_v53, %v2712_v53  ;;  %v1575_v57 = vsel %vm1319_vm3, %v2712_v53, 0.0  ;;  %v2714_v4 = vpop.eup %2713 }
 0x2fc   : > { %1576 = vadd.xlane.f32.xlu0 %v1575_v57  ;;  %v1552_v23 = vmul.f32 0.0, %v2714_v4  ;;  %v2716_v58 = vpop.eup %2715 }
 0x2fd   : > { %2531 = vmatmul.msk.bf16.vlgmr.msrb.gmra.mxu2 %vm1319_vm3, %v1597_v54  ;;  %v2718_v29 = vpop.eup %2717  ;;  %v1554_v32 = vmul.f32 0.0, %v2716_v58 }
 0x2fe   : > { %v1555_v33 = vmul.f32 0.0, %v2718_v29  ;;  %v2720_v35 = vpop.eup %2719 }
 0x2ff   : > { %v2722_v13 = vpop.eup %2721  ;;  %v1553_v41 = vmul.f32 0.0, %v2720_v35 }
 0x300   : > { %v1556_v39 = vmul.f32 0.0, %v2722_v13 }
 0x345   : > { %v1562_v9 = vpop.xlane.xlu1 %1561 }
 0x346   : > { %v1584_v28 = vadd.f32 %v1562_v9, %v1552_v23 }
 0x348   : > { %2723 = vrcp.f32 %v1584_v28 }
 0x349   : > { %2725 = vpow2.f32 %v1524_v17 }
 0x34e   : > { %v2724_v36 = vpop.eup %2723 }
 0x34f   : > { %v2726_v12 = vpop.eup %2725 }
 0x350   : > { %v1616_v48 = vpop.f32.mrf.mxu1  ;;  %v1558_v52 = vmul.f32 0.0, %v2726_v12 }
 0x351   : > { %v1753_v6 = vadd.f32 %v1616_v48, %v1552_v23 }
 0x353   : > { %v1769_v38 = vmul.f32 %v2724_v36, %v1753_v6 }
 0x355   : > { %v1780_v40 = vrot.slane %v1769_v38, 4 }
 0x358   : > { %v1618_v25 = vpop.f32.mrf.mxu1 }
 0x35a   : > { %v1571_v7 = vpop.xlane.xlu2 %1570 }
 0x35b   : > { %v1587_v30 = vadd.f32 %v1571_v7, %v1555_v33 }
 0x35e   : > { %v1574_v19 = vpop.xlane.xlu0 %1573 }
 0x35f   : > { %v1588_v56 = vadd.f32 %v1574_v19, %v1556_v39 }
 0x360   : > { %v1635_v14 = vpop.f32.mrf.mxu2 }
 0x361   : > { %v1754_v3 = vadd.f32 %v1635_v14, %v1553_v41 }
 0x362   : > { %v1568_v61 = vpop.xlane.xlu2 %1567 }
 0x363   : > { %v1586_v34 = vadd.f32 %v1568_v61, %v1554_v32  ;;  %v1654_v24 = vpop.f32.mrf.mxu3  ;;  %v1583_v51 = vpop.xlane.xlu1 %1582 }
 0x364   : > { %v1755_v43 = vadd.f32 %v1654_v24, %v1554_v32 }
 0x365   : > { %2727 = vrcp.f32 %v1586_v34  ;;  %v1673_v59 = vpop.f32.mrf.mxu0 }
 0x366   : > { %2729 = vpow2.f32 %v1526_v45  ;;  %v1756_v47 = vadd.f32 %v1673_v59, %v1555_v33 }
 0x367   : > { %2731 = vrcp.f32 %v1587_v30  ;;  %v1580_v5 = vpop.xlane.xlu0 %1579 }
 0x368   : > { %v1637_v37 = vpop.f32.mrf.mxu2  ;;  %2733 = vpow2.f32 %v1522_v27  ;;  %v1590_v62 = vadd.f32 %v1580_v5, %v1558_v52 }
 0x369   : > { %v1692_v10 = vpop.f32.mrf.mxu1 }
 0x36a   : > { %v1565_v11 = vpop.xlane.xlu2 %1564  ;;  %v1757_v16 = vadd.f32 %v1692_v10, %v1556_v39 }
 0x36b   : > { %v2728_v55 = vpop.eup %2727  ;;  %v1585_v44 = vadd.f32 %v1565_v11, %v1553_v41  ;;  %v1656_v42 = vpop.f32.mrf.mxu3 }
 0x36c   : > { %v2730_v20 = vpop.eup %2729  ;;  %v1771_v49 = vmul.f32 %v2728_v55, %v1755_v43 }
 0x36d   : > { %2735 = vrcp.f32 %v1585_v44  ;;  %v1675_v50 = vpop.f32.mrf.mxu0  ;;  %v2732_v54 = vpop.eup %2731  ;;  %v1559_v57 = vmul.f32 0.0, %v2730_v20 }
 0x36e   : > { %v1777_v18 = vrot.slane %v1771_v49, 4  ;;  %v1781_v53 = vsel %vm637_vm2, %v1771_v49, %v1780_v40  ;;  %2737 = vrcp.f32 %v1588_v56  ;;  %v2734_v60 = vpop.eup %2733  ;;  %v1772_v48 = vmul.f32 %v2732_v54, %v1756_v47 }
 0x36f   : > { %v1591_v0 = vadd.f32 %v1583_v51, %v1559_v57  ;;  %v1577_v25 = vpop.xlane.xlu0 %1576  ;;  %v1557_v9 = vmul.f32 0.0, %v2734_v60  ;;  %2739 = vrcp.f32 %v1590_v62  ;;  %v1789_v7 = vperm.slane %v1781_v53, %v3171_v21 }
 0x370   : > { %v1779_v63 = vsel %vm637_vm2, %v1777_v18, %v1769_v38  ;;  %v1790_v15 = vrot.slane %v1772_v48, 4 }
 0x371   : > { %v1694_v2 = vpop.f32.mrf.mxu1  ;;  %v1785_v22 = vperm.slane %v1779_v63, %v3171_v21  ;;  %2741 = vrcp.f32 %v1591_v0  ;;  %v1589_v58 = vadd.f32 %v1577_v25, %v1557_v9  ;;  %v1816_v17 = vrot.slane %v1789_v7, 4 }
 0x373   : > { %v2736_v4 = vpop.eup %2735  ;;  %v1804_v14 = vrot.slane %v1785_v22, 4  ;;  %2743 = vrcp.f32 %v1589_v58 }
 0x374   : > { %v1770_v23 = vmul.f32 %v2736_v4, %v1754_v3  ;;  %v2738_v26 = vpop.eup %2737 }
 0x375   : > { %v1749_v8 = vpop.f32.mrf.mxu0  ;;  %v1773_v28 = vmul.f32 %v2738_v26, %v1757_v16  ;;  %v2740_v6 = vpop.eup %2739 }
 0x376   : > { %v1791_v1 = vsel %vm637_vm2, %v1790_v15, %v1770_v23  ;;  %v1792_v19 = vrot.slane %v1770_v23, 4  ;;  %v1760_v46 = vadd.f32 %v1749_v8, %v1559_v57 }
 0x377   : > { %v1797_v29 = vperm.slane %v1791_v1, %v3171_v21  ;;  %v1836_v35 = vrot.slane %v1773_v28, 4  ;;  %v2742_v59 = vpop.eup %2741 }
 0x378   : > { %v1793_v32 = vsel %vm637_vm2, %v1772_v48, %v1792_v19  ;;  %v1730_v45 = vpop.f32.mrf.mxu3  ;;  %v1776_v5 = vmul.f32 %v2742_v59, %v1760_v46 }
 0x379   : > { %v1801_v61 = vperm.slane %v1793_v32, %v3171_v21  ;;  %v1802_v33 = vrot.slane %v1797_v29, 4  ;;  %v1805_v34 = vsel %vm637_vm2, %v1797_v29, %v1804_v14  ;;  %v1759_v24 = vadd.f32 %v1730_v45, %v1558_v52  ;;  %v2744_v47 = vpop.eup %2743 }
 0x37a   : > { %v1813_v30 = vperm.slane %v1805_v34, %v3182_v31  ;;  %v1846_v51 = vrot.slane %v1776_v5, 4 }
 0x37b   : > { %v1803_v13 = vsel %vm637_vm2, %v1802_v33, %v1785_v22  ;;  %v1814_v27 = vrot.slane %v1801_v61, 4  ;;  %v1817_v36 = vsel %vm637_vm2, %v1801_v61, %v1816_v17  ;;  %v1775_v37 = vmul.f32 %v2740_v6, %v1759_v24 }
 0x37c   : > { %v1809_v38 = vperm.slane %v1803_v13, %v3182_v31  ;;  %v1825_v39 = vperm.slane %v1817_v36, %v3182_v31  ;;  %v1828_v41 = vrot.slane %v1813_v30, 4 }
 0x37d   : > { %v1815_v10 = vsel %vm637_vm2, %v1814_v27, %v1789_v7  ;;  %v1834_v12 = vrot.slane %v1775_v37, 4  ;;  %v1837_v43 = vsel %vm637_vm2, %v1775_v37, %v1836_v35  ;;  %v1751_v11 = vpop.f32.mrf.mxu0 }
 0x37e   : > { %v1829_v55 = vsel %vm637_vm2, 0.0, %v1828_v41  ;;  %v1832_v56 = vrot.slane %v1825_v39, 4  ;;  %v1821_v44 = vperm.slane %v1815_v10, %v3182_v31  ;;  %v1826_v40 = vrot.slane %v1809_v38, 4 }
 0x37f   : > { %v1895_v42 = vrot.slane %v1829_v55, 4  ;;  %v1835_v20 = vsel %vm637_vm2, %v1834_v12, %v1773_v28  ;;  %v1890_v49 = vsel %vm637_vm2, %v1828_v41, %v1809_v38  ;;  %v1845_v48 = vperm.slane %v1837_v43, %v3171_v21 }
 0x380   : > { %v1841_v50 = vperm.slane %v1835_v20, %v3171_v21  ;;  %v1711_v52 = vpop.f32.mrf.mxu2  ;;  %v1732_v18 = vpop.f32.mrf.mxu3  ;;  %v1830_v53 = vrot.slane %v1821_v44, 4  ;;  %v1833_v54 = vsel %vm637_vm2, 0.0, %v1832_v56  ;;  %v1827_v60 = vsel %vm637_vm2, 0.0, %v1826_v40 }
 0x381   : > { %v1758_v57 = vadd.f32 %v1711_v52, %v1557_v9  ;;  %v1894_v62 = vperm.slane %v1890_v49, %v3171_v21  ;;  %v1901_v63 = vsel %vm637_vm2, %v1832_v56, %v1821_v44  ;;  %v1896_v2 = vsel %vm637_vm2, %v1895_v42, %v1827_v60 }
 0x382   : > { %v1831_v0 = vsel %vm637_vm2, 0.0, %v1830_v53  ;;  %v1905_v3 = vperm.slane %v1901_v63, %v3171_v21  ;;  %v1900_v4 = vperm.slane %v1896_v2, %v3171_v21  ;;  %v1906_v22 = vrot.slane %v1833_v54, 4 }
 0x383   : > { %v1774_v16 = vmul.f32 %v2744_v47, %v1758_v57  ;;  %v1914_v25 = vrot.slane %v1894_v62, 4  ;;  %v1860_v9 = vrot.slane %v1841_v50, 4  ;;  %v1872_v14 = vrot.slane %v1845_v48, 4 }
 0x384   : > { %v1926_v7 = vrot.slane %v1905_v3, 4  ;;  %v1907_v26 = vsel %vm637_vm2, %v1906_v22, %v1831_v0  ;;  %v1912_v19 = vrot.slane %v1900_v4, 4 }
 0x385   : > { %v1847_v15 = vsel %vm637_vm2, %v1846_v51, %v1774_v16  ;;  %v1848_v23 = vrot.slane %v1774_v16, 4  ;;  %v1915_v8 = vsel %vm637_vm2, %v1900_v4, %v1914_v25  ;;  %v1911_v58 = vperm.slane %v1907_v26, %v3171_v21 }
 0x386   : > { %v1853_v28 = vperm.slane %v1847_v15, %v3171_v21  ;;  %v1923_v1 = vperm.slane %v1915_v8, %v3182_v31  ;;  %v1913_v6 = vsel %vm637_vm2, %v1912_v19, %v1894_v62 }
 0x387   : > { %v1849_v29 = vsel %vm637_vm2, %v1776_v5, %v1848_v23  ;;  %v1927_v61 = vsel %vm637_vm2, %v1911_v58, %v1926_v7  ;;  %v1919_v13 = vperm.slane %v1913_v6, %v3182_v31  ;;  %v1924_v5 = vrot.slane %v1911_v58, 4 }
 0x388   : > { %v1857_v17 = vperm.slane %v1849_v29, %v3171_v21  ;;  %v1858_v32 = vrot.slane %v1853_v28, 4  ;;  %v1861_v45 = vsel %vm637_vm2, %v1853_v28, %v1860_v9  ;;  %v1713_v46 = vpop.f32.mrf.mxu2  ;;  %v1935_v34 = vperm.slane %v1927_v61, %v3182_v31 }
 0x389   : > { %v1869_v33 = vperm.slane %v1861_v45, %v3182_v31  ;;  %v1942_v24 = vrot.slane %v1923_v1, 4  ;;  %v1938_v10 = vrot.slane %v1919_v13, 4  ;;  %v1925_v20 = vsel %vm637_vm2, %v1924_v5, %v1905_v3 }
 0x38a   : > { %v1859_v35 = vsel %vm637_vm2, %v1858_v32, %v1841_v50  ;;  %v1870_v30 = vrot.slane %v1857_v17, 4  ;;  %v1873_v59 = vsel %vm637_vm2, %v1857_v17, %v1872_v14  ;;  %v1940_v41 = vrot.slane %v1935_v34, 4 }
 0x38b   : > { %v1865_v27 = vperm.slane %v1859_v35, %v3182_v31  ;;  %v1881_v36 = vperm.slane %v1873_v59, %v3182_v31  ;;  %v1884_v37 = vrot.slane %v1869_v33, 4  ;;  %v1943_v38 = vsel %vm637_vm2, %v1935_v34, %v1942_v24  ;;  %v2580_v33 = vld [vmem:[%s3129_s11] sm:$0xff] }
 0x38c   : > { %v1871_v39 = vsel %vm637_vm2, %v1870_v30, %v1845_v48  ;;  %v1941_v42 = vsel %vm637_vm2, %v1940_v41, %v1923_v1  ;;  %v1931_v53 = vperm.slane %v1925_v20, %v3182_v31 }
 0x38d   : > { %v1877_v12 = vperm.slane %v1871_v39, %v3182_v31  ;;  %v1882_v43 = vrot.slane %v1865_v27, 4  ;;  %v1885_v11 = vsel %vm637_vm2, 0.0, %v1884_v37  ;;  %v1888_v55 = vrot.slane %v1881_v36, 4 }
 0x38e   : > { %v1944_v56 = vsel %vm637_vm2, %v1884_v37, %v1865_v27  ;;  %v1949_v44 = vrot.slane %v1885_v11, 4  ;;  %v1936_v48 = vrot.slane %v1931_v53, 4  ;;  %v1939_v0 = vsel %vm637_vm2, %v1931_v53, %v1938_v10 }
 0x38f   : > { %v1883_v40 = vsel %vm637_vm2, 0.0, %v1882_v43  ;;  %v1886_v49 = vrot.slane %v1877_v12, 4  ;;  %v1889_v47 = vsel %vm637_vm2, 0.0, %v1888_v55  ;;  %v1948_v50 = vperm.slane %v1944_v56, %v3171_v21  ;;  %v3661_v43 = vld [vmem:[%s3144_s12] sm:$0x3f] }
 0x390   : > { %v1960_v51 = vrot.slane %v1889_v47, 4  ;;  %v1950_v52 = vsel %vm637_vm2, %v1949_v44, %v1883_v40  ;;  %v1955_v18 = vsel %vm637_vm2, %v1888_v55, %v1877_v12  ;;  %v1937_v25 = vsel %vm637_vm2, %v1936_v48, %v1919_v13  ;;  %v2755_v44 = vld [vmem:[#allocation2] sm:$0xff]  ;;  %v2756_v47 = vld [vmem:[#allocation2 + $0x8] sm:$0xff] }
 0x391   : > { %v1887_v54 = vsel %vm637_vm2, 0.0, %v1886_v49  ;;  %v1954_v57 = vperm.slane %v1950_v52, %v3171_v21  ;;  %v1959_v60 = vperm.slane %v1955_v18, %v3171_v21  ;;  %v1968_v62 = vrot.slane %v1948_v50, 4 }
 0x392   : > { %v1961_v63 = vsel %vm637_vm2, %v1960_v51, %v1887_v54  ;;  %v2035_v11 = vperm.slane %v3661_v43, 0  ;;  %v2954_v52 = vmov 32.0  }
 0x393   : > { %v1965_v2 = vperm.slane %v1961_v63, %v3171_v21  ;;  %v1969_v3 = vsel %vm637_vm2, %v1954_v57, %v1968_v62  ;;  %v1980_v16 = vrot.slane %v1959_v60, 4  ;;  %v1966_v4 = vrot.slane %v1954_v57, 4 }
 0x394   : > { %v1977_v22 = vperm.slane %v1969_v3, %v3182_v31  ;;  %2745 = vrcp.f32 %v2954_v52 }
 0x395   : > { %v1981_v9 = vsel %vm637_vm2, %v1965_v2, %v1980_v16  ;;  %v1967_v7 = vsel %vm637_vm2, %v1966_v4, %v1948_v50  ;;  %v1978_v15 = vrot.slane %v1965_v2, 4 }
 0x396   : > { %v1989_v23 = vperm.slane %v1981_v9, %v3182_v31  ;;  %v1996_v26 = vrot.slane %v1977_v22, 4  ;;  %v1973_v8 = vperm.slane %v1967_v7, %v3182_v31 }
 0x397   : > { %v1979_v21 = vsel %vm637_vm2, %v1978_v15, %v1959_v60  ;;  %v2583_v15 = vld [vmem:[%s3134_s21 + $0x8] sm:$0xff] }
 0x398   : > { %v1997_v28 = vsel %vm637_vm2, %v1989_v23, %v1996_v26  ;;  %v1994_v58 = vrot.slane %v1989_v23, 4  ;;  %v1985_v1 = vperm.slane %v1979_v21, %v3182_v31  ;;  %v1992_v19 = vrot.slane %v1973_v8, 4  ;;  %v2581_v31 = vld [vmem:[%s3129_s11 + $0x8] sm:$0xff]  ;;  %2154 = vmatpush.bf16.msra.mxu2 %v2583_v15 }
 0x399   : > { %v2690_v14 = vpack.i.bf16 %v1997_v28, %v1943_v38  ;;  %2057 = vmatpush.bf16.msra.mxu1 %v2581_v31 }
 0x39a   : > { %v1995_v29 = vsel %vm637_vm2, %v1994_v58, %v1977_v22  ;;  %v1990_v17 = vrot.slane %v1985_v1, 4  ;;  %v1993_v32 = vsel %vm637_vm2, %v1985_v1, %v1992_v19  ;;  %v2746_v18 = vpop.eup %2745 }
 0x39b   : > { %2691 = vrot.lane.b32.xlu0 %v2690_v14, %s2951_s0  ;;  %v2685_v45 = vpack.i.bf16 %v1995_v29, %v1941_v42  ;;  %v2680_v46 = vpack.i.bf16 %v1993_v32, %v1939_v0  ;;  %v2074_v53 = vmul.f32 32.0, %v2746_v18  ;;  %vm2078_vm7 = vweird.f32 %v2746_v18 }
 0x39c   : > { %v1991_v61 = vsel %vm637_vm2, %v1990_v17, %v1973_v8  ;;  %v2582_v8 = vld [vmem:[%s3134_s21] sm:$0xff] }
 0x39d   : > { %2686 = vrot.lane.b32.xlu2 %v2685_v45, %s2952_s19  ;;  %2681 = vrot.lane.b32.xlu1 %v2680_v46, %s2953_s25  ;;  %v2075_v54 = vsub.f32 1.0, %v2074_v53 }
 0x39e   : > { %2058 = vmatpush.bf16.msra.mxu1 %v2580_v33  ;;  %2155 = vmatpush.bf16.msra.mxu2 %v2582_v8 }
 0x39f   : > { %v2076_v57 = vmul.f32 %v2746_v18, %v2075_v54 }
 0x3a1   : > { %v2077_v60 = vadd.f32 %v2746_v18, %v2076_v57 }
 0x3a3   : > { %v3666_v62 = vsel %vm2078_vm7, %v2746_v18, %v2077_v60 }
 0x3f7   : > { %v2687_v34 = vpop.permute.xlu2 %2686 }
 0x3f8   : > { %v2689_v59 = vunpack.i.h.bf16 %v2687_v34  ;;  %v2688_v13 = vunpack.i.l.bf16 %v2687_v34 }
 0x40d   : > { %v2692_v24 = vpop.permute.xlu0 %2691 }
 0x40e   : > { %v2694_v27 = vunpack.i.h.bf16 %v2692_v24  ;;  %v2693_v36 = vunpack.i.l.bf16 %v2692_v24  ;;  %v2118_v24 = vperm.slane %v3661_v43, 2 }
 0x40f   : > { %v2682_v6 = vpop.permute.xlu1 %2681 }
 0x410   : > { %v2684_v35 = vunpack.i.h.bf16 %v2682_v6  ;;  %v2683_v30 = vunpack.i.l.bf16 %v2682_v6 }
 0x412   : > { %v2022_v37 = vsel %vm1319_vm3, %v1937_v25, %v2683_v30  ;;  %v2023_v38 = vsel %vm1319_vm3, %v1991_v61, %v2684_v35 }
 0x413   : > { %v2025_v39 = vsel %vm2024_vm5, %v2022_v37, %v2688_v13  ;;  %v2026_v41 = vsel %vm2024_vm5, %v2023_v38, %v2689_v59  ;;  %v2121_v59 = vperm.slane %v3661_v43, 3 }
 0x414   : > { %v2028_v5 = vsel %vm2027_vm6, %v2025_v39, %v2693_v36  ;;  %v2029_v10 = vsel %vm2027_vm6, %v2026_v41, %v2694_v27  ;;  %v2587_v41 = vld [vmem:[%s3139_s5 + $0x18] sm:$0xff] }
 0x415   : > { %v2030_v12 = vpack.c.bf16 %v2029_v10, %v2028_v5  ;;  %2206 = vmatpush.bf16.msra.mxu3 %v2587_v41  ;;  %v2586_v5 = vld [vmem:[%s3139_s5 + $0x10] sm:$0xff]  ;;  %v2585_v10 = vld [vmem:[%s3139_s5 + $0x8] sm:$0xff] }
 0x417   : > { %2542 = vmatmul.msk.bf16.vlgmr.msra.gmra.mxu1 %vm568_vm1, %v2030_v12  ;;  %v2584_v12 = vld [vmem:[%s3139_s5] sm:$0xff] }
 0x419   : > { %2207 = vmatpush.bf16.msra.mxu3 %v2586_v5 }
 0x41d   : > { %2208 = vmatpush.bf16.msra.mxu3 %v2585_v10 }
 0x421   : > { %2209 = vmatpush.bf16.msra.mxu3 %v2584_v12 }
 0x494   : > { %v2060_v55 = vpop.f32.mrf.mxu1 }
 0x495   : > { %v2061_v56 = vadd.f32 %v2060_v55, %v2035_v11  ;;  %v2696_v55 = vld [vmem:[%s3146_s20] ss:$0 sm:$0xff] }
 0x497   : > { %v2065_v42 = vadd.f32 %v2755_v44, %v2061_v56 }
 0x499   : > { %v2067_v20 = vsel %vm568_vm1, %v2065_v42, 0.0 }
 0x49a   : > { %2068 = vadd.xlane.f32.xlu1 %v2067_v20 }
 0x49c   : > { %v2062_v40 = vpop.f32.mrf.mxu1 }
 0x49d   : > { %v2063_v49 = vadd.f32 %v2062_v40, %v2035_v11 }
 0x49f   : > { %v2066_v50 = vadd.f32 %v2756_v47, %v2063_v49  ;;  %v2173_v47 = vperm.slane %v3661_v43, 1 }
 0x4a1   : > { %v2070_v51 = vsel %vm568_vm1, %v2066_v50, 0.0 }
 0x4a2   : > { %2071 = vadd.xlane.f32.xlu0 %v2070_v51 }
 0x50d   : > { %v2069_v63 = vpop.xlane.xlu1 %2068 }
 0x50e   : > { %v2080_v48 = vmul.f32 %v3666_v62, %v2069_v63 }
 0x510   : > { %v2082_v0 = vsub.f32 %v2065_v42, %v2080_v48 }
 0x512   : > { %v2084_v2 = vmul.f32 %v2082_v0, %v2082_v0 }
 0x514   : > { %v2086_v3 = vsel %vm568_vm1, %v2084_v2, 0.0 }
 0x515   : > { %v2072_v16 = vpop.xlane.xlu0 %2071  ;;  %2087 = vadd.xlane.f32.xlu2 %v2086_v3 }
 0x516   : > { %v2081_v4 = vmul.f32 %v3666_v62, %v2072_v16 }
 0x518   : > { %v2083_v22 = vsub.f32 %v2066_v50, %v2081_v4 }
 0x51a   : > { %v2085_v25 = vmul.f32 %v2083_v22, %v2083_v22 }
 0x51c   : > { %v2089_v9 = vsel %vm568_vm1, %v2085_v25, 0.0 }
 0x51d   : > { %2090 = vadd.xlane.f32.xlu1 %v2089_v9 }
 0x588   : > { %v2088_v7 = vpop.xlane.xlu2 %2087 }
 0x589   : > { %v2092_v23 = vmul.f32 %v2088_v7, %v3666_v62 }
 0x58b   : > { %v2094_v26 = vadd.f32 1e-05, %v2092_v23 }
 0x58d   : > { %2747 = vrsqrt.f32 %v2094_v26  ;;  %vm2102_vm9 = vweird.f32 %v2094_v26 }
 0x590   : > { %v2091_v21 = vpop.xlane.xlu1 %2090 }
 0x591   : > { %v2093_v28 = vmul.f32 %v2091_v21, %v3666_v62 }
 0x593   : > { %v2748_v58 = vpop.eup %2747  ;;  %v2095_v1 = vadd.f32 1e-05, %v2093_v28 }
 0x594   : > { %v2097_v19 = vmul.f32 %v2748_v58, %v2094_v26  ;;  %vm2103_vm8 = vweird.f32 %v2748_v58 }
 0x595   : > { %2749 = vrsqrt.f32 %v2095_v1  ;;  %vm2104_vm10 = vmor %vm2102_vm9, %vm2103_vm8  ;;  %vm2112_vm12 = vweird.f32 %v2095_v1 }
 0x596   : > { %v2098_v14 = vmul.f32 %v2748_v58, %v2097_v19 }
 0x598   : > { %v2099_v29 = vmul.f32 0.5, %v2098_v14 }
 0x59a   : > { %v2100_v17 = vsub.f32 1.5, %v2099_v29 }
 0x59b   : > { %v2750_v32 = vpop.eup %2749 }
 0x59c   : > { %v2101_v45 = vmul.f32 %v2748_v58, %v2100_v17  ;;  %v2107_v46 = vmul.f32 %v2750_v32, %v2095_v1  ;;  %vm2113_vm11 = vweird.f32 %v2750_v32 }
 0x59d   : > { %vm2114_vm13 = vmor %vm2112_vm12, %vm2113_vm11 }
 0x59e   : > { %v2108_v61 = vmul.f32 %v2750_v32, %v2107_v46  ;;  %v2105_v31 = vsel %vm2104_vm10, %v2748_v58, %v2101_v45  ;;  %v2262_v45 = vperm.slane %v3661_v43, 4 }
 0x59f   : > { %v2116_v6 = vmul.f32 %v2105_v31, %v2082_v0  ;;  %v2265_v31 = vperm.slane %v3661_v43, 5 }
 0x5a0   : > { %v2109_v33 = vmul.f32 0.5, %v2108_v61 }
 0x5a1   : > { %v2119_v13 = vmul.f32 %v2118_v24, %v2116_v6 }
 0x5a2   : > { %v2110_v34 = vsub.f32 1.5, %v2109_v33 }
 0x5a3   : > { %v2122_v37 = vadd.f32 %v2121_v59, %v2119_v13 }
 0x5a4   : > { %v2111_v35 = vmul.f32 %v2750_v32, %v2110_v34 }
 0x5a6   : > { %v2115_v30 = vsel %vm2114_vm13, %v2750_v32, %v2111_v35 }
 0x5a7   : > { %v2117_v27 = vmul.f32 %v2115_v30, %v2083_v22 }
 0x5a9   : > { %v2120_v36 = vmul.f32 %v2118_v24, %v2117_v27 }
 0x5ab   : > { %v2123_v38 = vadd.f32 %v2121_v59, %v2120_v36 }
 0x5ad   : > { %v2124_v39 = vpack.c.bf16 %v2123_v38, %v2122_v37 }
 0x5af   : > { %2551 = vmatmul.msk.bf16.vlgmr.msra.gmra.mxu2 %vm568_vm1, %v2124_v39 }
 0x632   : > { %v2157_v11 = vpop.f32.mrf.mxu2 }
 0x633   : > { %v2158_v56 = vadd.f32 %v2696_v55, %v2157_v11 }
 0x635   : > { %v2162_v20 = vmax.f32 %v2158_v56, 0.0 }
 0x63a   : > { %v2159_v44 = vpop.f32.mrf.mxu2 }
 0x63b   : > { %v2160_v42 = vadd.f32 %v2696_v55, %v2159_v44 }
 0x63d   : > { %v2163_v40 = vmax.f32 %v2160_v42, 0.0 }
 0x63f   : > { %v2164_v49 = vpack.c.bf16 %v2163_v40, %v2162_v20 }
 0x641   : > { %2568 = vmatmul.msk.bf16.vlgmr.msra.gmra.mxu3 %vm2198_vm14, %v2164_v49 }
 0x6c4   : > { %v2211_v50 = vpop.f32.mrf.mxu3 }
 0x6c5   : > { %v2212_v51 = vadd.f32 %v2211_v50, %v2173_v47 }
 0x6c7   : > { %v2216_v52 = vadd.f32 %v2212_v51, %v2122_v37 }
 0x6c9   : > { %v2218_v18 = vsel %vm568_vm1, %v2216_v52, 0.0 }
 0x6ca   : > { %2219 = vadd.xlane.f32.xlu0 %v2218_v18 }
 0x6cc   : > { %v2213_v53 = vpop.f32.mrf.mxu3 }
 0x6cd   : > { %v2214_v54 = vadd.f32 %v2213_v53, %v2173_v47 }
 0x6cf   : > { %v2217_v57 = vadd.f32 %v2214_v54, %v2123_v38 }
 0x6d1   : > { %v2221_v60 = vsel %vm568_vm1, %v2217_v57, 0.0 }
 0x6d2   : > { %2222 = vadd.xlane.f32.xlu2 %v2221_v60 }
 0x73d   : > { %v2220_v63 = vpop.xlane.xlu0 %2219 }
 0x73e   : > { %v2224_v48 = vmul.f32 %v2220_v63, %v3666_v62 }
 0x740   : > { %v2226_v0 = vsub.f32 %v2216_v52, %v2224_v48 }
 0x742   : > { %v2228_v2 = vmul.f32 %v2226_v0, %v2226_v0 }
 0x744   : > { %v2230_v3 = vsel %vm568_vm1, %v2228_v2, 0.0 }
 0x745   : > { %v2223_v16 = vpop.xlane.xlu2 %2222  ;;  %2231 = vadd.xlane.f32.xlu1 %v2230_v3 }
 0x746   : > { %v2225_v4 = vmul.f32 %v2223_v16, %v3666_v62 }
 0x748   : > { %v2227_v22 = vsub.f32 %v2217_v57, %v2225_v4 }
 0x74a   : > { %v2229_v25 = vmul.f32 %v2227_v22, %v2227_v22 }
 0x74c   : > { %v2233_v9 = vsel %vm568_vm1, %v2229_v25, 0.0 }
 0x74d   : > { %2234 = vadd.xlane.f32.xlu0 %v2233_v9 }
 0x7b8   : > { %v2232_v7 = vpop.xlane.xlu1 %2231 }
 0x7b9   : > { %v2236_v15 = vmul.f32 %v2232_v7, %v3666_v62 }
 0x7bb   : > { %v2238_v23 = vadd.f32 1e-05, %v2236_v15 }
 0x7bd   : > { %2751 = vrsqrt.f32 %v2238_v23  ;;  %vm2246_vm0 = vweird.f32 %v2238_v23 }
 0x7c0   : > { %v2235_v26 = vpop.xlane.xlu0 %2234 }
 0x7c1   : > { %v2237_v8 = vmul.f32 %v2235_v26, %v3666_v62 }
 0x7c3   : > { %v2752_v21 = vpop.eup %2751  ;;  %v2239_v28 = vadd.f32 1e-05, %v2237_v8 }
 0x7c4   : > { %v2241_v58 = vmul.f32 %v2752_v21, %v2238_v23  ;;  %vm2247_vm15 = vweird.f32 %v2752_v21 }
 0x7c5   : > { %2753 = vrsqrt.f32 %v2239_v28  ;;  %vm2248_vm2 = vmor %vm2246_vm0, %vm2247_vm15  ;;  %vm2256_vm4 = vweird.f32 %v2239_v28 }
 0x7c6   : > { %v2242_v1 = vmul.f32 %v2752_v21, %v2241_v58 }
 0x7c8   : > { %v2243_v19 = vmul.f32 0.5, %v2242_v1 }
 0x7ca   : > { %v2244_v14 = vsub.f32 1.5, %v2243_v19 }
 0x7cb   : > { %v2754_v29 = vpop.eup %2753 }
 0x7cc   : > { %v2245_v17 = vmul.f32 %v2752_v21, %v2244_v14  ;;  %v2251_v32 = vmul.f32 %v2754_v29, %v2239_v28  ;;  %vm2257_vm3 = vweird.f32 %v2754_v29 }
 0x7cd   : > { %vm2258_vm5 = vmor %vm2256_vm4, %vm2257_vm3 }
 0x7ce   : > { %v2249_v46 = vsel %vm2248_vm2, %v2752_v21, %v2245_v17  ;;  %v2252_v61 = vmul.f32 %v2754_v29, %v2251_v32 }
 0x7cf   : > { %v2260_v33 = vmul.f32 %v2249_v46, %v2226_v0 }
 0x7d0   : > { %v2253_v34 = vmul.f32 0.5, %v2252_v61 }
 0x7d1   : > { %v2263_v24 = vmul.f32 %v2262_v45, %v2260_v33 }
 0x7d2   : > { %v2254_v6 = vsub.f32 1.5, %v2253_v34 }
 0x7d3   : > { %v2266_v35 = vadd.f32 %v2265_v31, %v2263_v24 }
 0x7d4   : > { %v2255_v30 = vmul.f32 %v2754_v29, %v2254_v6 }
 0x7d5   : > { %2268 = vst.msk [vmem:[#allocation2] sm:$0xff] %vm568_vm1, %v2266_v35 }
 0x7d6   : > { %v2259_v59 = vsel %vm2258_vm5, %v2754_v29, %v2255_v30 }
 0x7d7   : > { %v2261_v13 = vmul.f32 %v2259_v59, %v2227_v22 }
 0x7d9   : > { %v2264_v27 = vmul.f32 %v2262_v45, %v2261_v13  ;;  %2273 = sbr.rel (%p2569_p3) target bundleno = 2291 (0x8f3), region = 80 }
 0x7db   : > { %v2267_v36 = vadd.f32 %v2265_v31, %v2264_v27 }
 0x7dd   : > { %2269 = vst.msk [vmem:[#allocation2 + $0x8] sm:$0xff] %vm568_vm1, %v2267_v36 }
 0x7de   : > { %v2276_v43 = vsel %vm568_vm1, %v2266_v35, 0.0  ;;  %v2279_v37 = vsel %vm568_vm1, %v2267_v36, 0.0  ;;  %v2757_v48 = vld [vmem:[%s3745_s8] ss:$0 sm:$0xff] }
 0x7df   : > { %2277 = vadd.xlane.f32.xlu0 %v2276_v43  ;;  %v2758_v3 = vld [vmem:[%s3746_s9] ss:$0 sm:$0xff] }
 0x7e7   : > { %2280 = vadd.xlane.f32.xlu0 %v2279_v37 }
 0x852   : > { %v2278_v38 = vpop.xlane.xlu0 %2277 }
 0x853   : > { %v2282_v39 = vmul.f32 %v2278_v38, %v3666_v62 }
 0x855   : > { %v2284_v41 = vsub.f32 %v2266_v35, %v2282_v39 }
 0x857   : > { %v2286_v5 = vmul.f32 %v2284_v41, %v2284_v41 }
 0x859   : > { %v2288_v10 = vsel %vm568_vm1, %v2286_v5, 0.0 }
 0x85a   : > { %2289 = vadd.xlane.f32.xlu1 %v2288_v10  ;;  %v2281_v12 = vpop.xlane.xlu0 %2280 }
 0x85b   : > { %v2283_v11 = vmul.f32 %v2281_v12, %v3666_v62 }
 0x85d   : > { %v2285_v55 = vsub.f32 %v2267_v36, %v2283_v11 }
 0x85f   : > { %v2287_v56 = vmul.f32 %v2285_v55, %v2285_v55 }
 0x861   : > { %v2291_v44 = vsel %vm568_vm1, %v2287_v56, 0.0 }
 0x862   : > { %2292 = vadd.xlane.f32.xlu1 %v2291_v44 }
 0x8cd   : > { %v2290_v42 = vpop.xlane.xlu1 %2289 }
 0x8ce   : > { %v2294_v20 = vmul.f32 %v2290_v42, %v3666_v62 }
 0x8d0   : > { %v2296_v40 = vadd.f32 1e-05, %v2294_v20 }
 0x8d2   : > { %2759 = vrsqrt.f32 %v2296_v40  ;;  %vm2304_vm7 = vweird.f32 %v2296_v40 }
 0x8d5   : > { %v2293_v49 = vpop.xlane.xlu1 %2292 }
 0x8d6   : > { %v2295_v47 = vmul.f32 %v2293_v49, %v3666_v62 }
 0x8d8   : > { %v2760_v50 = vpop.eup %2759  ;;  %v2297_v51 = vadd.f32 1e-05, %v2295_v47 }
 0x8d9   : > { %v2299_v52 = vmul.f32 %v2760_v50, %v2296_v40  ;;  %vm2305_vm6 = vweird.f32 %v2760_v50 }
 0x8da   : > { %2761 = vrsqrt.f32 %v2297_v51  ;;  %vm2306_vm8 = vmor %vm2304_vm7, %vm2305_vm6  ;;  %vm2314_vm10 = vweird.f32 %v2297_v51 }
 0x8db   : > { %v2300_v18 = vmul.f32 %v2760_v50, %v2299_v52 }
 0x8dd   : > { %v2301_v53 = vmul.f32 0.5, %v2300_v18 }
 0x8df   : > { %v2302_v54 = vsub.f32 1.5, %v2301_v53 }
 0x8e0   : > { %v2762_v57 = vpop.eup %2761 }
 0x8e1   : > { %v2303_v60 = vmul.f32 %v2760_v50, %v2302_v54  ;;  %v2309_v63 = vmul.f32 %v2762_v57, %v2297_v51  ;;  %vm2315_vm9 = vweird.f32 %v2762_v57 }
 0x8e2   : > { %vm2316_vm11 = vmor %vm2314_vm10, %vm2315_vm9 }
 0x8e3   : > { %v2307_v0 = vsel %vm2306_vm8, %v2760_v50, %v2303_v60  ;;  %v2310_v2 = vmul.f32 %v2762_v57, %v2309_v63 }
 0x8e4   : > { %v2318_v62 = vmul.f32 %v2307_v0, %v2284_v41 }
 0x8e5   : > { %v2311_v16 = vmul.f32 0.5, %v2310_v2 }
 0x8e6   : > { %v2323_v4 = vmul.f32 %v2757_v48, %v2318_v62 }
 0x8e7   : > { %v2312_v22 = vsub.f32 1.5, %v2311_v16 }
 0x8e8   : > { %v2328_v25 = vadd.f32 %v2758_v3, %v2323_v4 }
 0x8e9   : > { %v2313_v9 = vmul.f32 %v2762_v57, %v2312_v22 }
 0x8ea   : > { %2330 = vst.msk [vmem:[#allocation9] sm:$0xff] %vm568_vm1, %v2328_v25 }
 0x8eb   : > { %v2317_v7 = vsel %vm2316_vm11, %v2762_v57, %v2313_v9 }
 0x8ec   : > { %v2319_v15 = vmul.f32 %v2317_v7, %v2285_v55 }
 0x8ee   : > { %v2324_v23 = vmul.f32 %v2757_v48, %v2319_v15 }
 0x8f0   : > { %v2329_v26 = vadd.f32 %v2758_v3, %v2324_v23 }
 0x8f2   : > { %2331 = vst.msk [vmem:[#allocation9 + $0x8] sm:$0xff] %vm568_vm1, %v2329_v26 }
 0x8f3 PF: > { %p2614_p4 = scmp.eq.s32.totalorder %s3074_s22, 1  ;;  %s2342_s26 = sshll.u32 %s3747_s10, 4  ;;  %s2343_s26 = int_to_ptr.hbm [resolvable:$true] %s2342_s26 }
 0x8f4   : > { %s2955_s27 = smov [#allocation9]   ;;  %s2956_s2 = smov 128  }
 0x8f5   : > { %s2340_s21 = sshll.u32 %s2955_s27, 4  ;;  %s2341_s21 = int_to_ptr.vmem [resolvable:$true] %s2340_s21 }
 0x8f6   : > { %2597 = dma.vmem_to_hbm [thread:$0]  (%p2614_p4), %s2341_s21, 256, %s2343_s26, [#allocation5], %s2956_s2, %s2956_s2, %s2953_s25  }
 0x8f7   : > { %2914 = dma.done.wait (%p2614_p4), [#allocation5], 256  }
 0x8f8   : > { %2916 = vsyncadd (%p2614_p4), [#allocation5], 4294967040 }
 0x8f9 PF: > { %s25_s18 = sadd.s32 1, %s2939_s18   ;;  %s3767_s13 = sld [smem:[#allocation13_spill]] }
 0x8fa   : > { %p22_p5 = scmp.ge.s32.totalorder %s25_s18, 4   ;;  %s3768_s14 = sld [smem:[#allocation14_spill]] }
 0x8fb   : > { %s3769_s15 = sld [smem:[#allocation17_spill]] }
 0x8fc   : > { %s3770_s16 = sld [smem:[#allocation15_spill]]  ;;  %24 = sbr.rel (!%p22_p5) target bundleno = 10 (0xa), region = 138 }
 0x8fd   : > { %s3771_s17 = sld [smem:[#allocation16_spill]] }
 0x901   :  { %2359 = vsyncpa [#allocation4], 1 }
 0x902   :  { %2361 = vsyncpa [#allocation4 + $0x1], 1 }
 0x903   :  { %2362 = vsyncpa [#allocation7], 1 }
 0x904   :  { %2364 = vsyncpa [#allocation7 + $0x1], 1 }
 0x905   :  { %2365 = vsyncpa [#allocation5], 1 }
 0x906   :  { %2367 = vsyncpa [#allocation5 + $0x1], 1 }

</bundles_post_ra>
